<compile_context>
chip_gen: v7x
topology: tpu7x:2x2x1
jax: 0.10.0
libtpu: 0.0.40
codegen_flags: <defaults>
</compile_context>

<pallas_src>
import functools

import numpy as np
import jax
import jax.numpy as jnp
from jax import lax
from jax.experimental import pallas as pl
from jax.experimental.pallas import tpu as pltpu

INPUT_SIZE = 16          # output spatial size S
H = W = 16               # input spatial size
C = 3                    # RGB
B = 2                    # batch

GRAY_R, GRAY_G, GRAY_B = 0.2989, 0.587, 0.114   # torchvision rgb_to_grayscale


# ----------------------------------------------------------------------------
# Pallas kernel: one block of TB images per grid step.
# ----------------------------------------------------------------------------
def _augment_kernel(params_ref, x_ref, wy_ref, wxT_ref, gy_ref, gxT_ref, o_ref,
                    *, tb):
    S = INPUT_SIZE
    blk = pl.program_id(0)

    def one_image(i, carry):
        n = blk * tb + i                       # global image index (SMEM params)
        bright = params_ref[n, 0]
        contr = params_ref[n, 1]
        satur = params_ref[n, 2]
        hue = params_ref[n, 3]
        gflag = params_ref[n, 4]

        x_slab = x_ref[i]                      # (H, C*W)    bf16, channels along lanes
        wy = wy_ref[i]                         # (S, H)      bf16, crop+vert bicubic
        wxT = wxT_ref[i]                       # (C*W, C*S)  bf16, kron(I3, WxT) (+hflip)
        gy = gy_ref[i]                         # (S, S)      bf16, vert blur (or I)
        gxT = gxT_ref[i]                       # (C*S, C*S)  bf16, kron(I3, GxT) (or I)

        # ---- RandomResizedCrop(bicubic) + hflip: 2 channel-stacked matmuls ----
        t = jnp.dot(wy, x_slab, preferred_element_type=jnp.float32)        # (S, C*W)
        slab = jnp.dot(t.astype(jnp.bfloat16), wxT,
                       preferred_element_type=jnp.float32)                 # (S, C*S)

        r = slab[:, 0:S]
        g = slab[:, S:2 * S]
        b = slab[:, 2 * S:3 * S]

        def clamp01(v):
            return jnp.clip(v, 0.0, 1.0)

        # ---- ColorJitter (RandomApply p=0.8 folded into identity params) -----
        # TODO(synk): torchvision applies the 4 jitter sub-ops in a random order;
        # a fixed order (brightness, contrast, saturation, hue) is used here.
        # brightness
        r, g, b = clamp01(r * bright), clamp01(g * bright), clamp01(b * bright)
        # contrast: blend with mean of grayscale
        gray = GRAY_R * r + GRAY_G * g + GRAY_B * b
        mean = jnp.mean(gray)
        r = clamp01(contr * r + (1.0 - contr) * mean)
        g = clamp01(contr * g + (1.0 - contr) * mean)
        b = clamp01(contr * b + (1.0 - contr) * mean)
        # saturation: blend with grayscale
        gray = GRAY_R * r + GRAY_G * g + GRAY_B * b
        r = clamp01(satur * r + (1.0 - satur) * gray)
        g = clamp01(satur * g + (1.0 - satur) * gray)
        b = clamp01(satur * b + (1.0 - satur) * gray)
        # hue: RGB -> HSV, shift, HSV -> RGB (torchvision tensor path)
        maxc = jnp.maximum(jnp.maximum(r, g), b)
        minc = jnp.minimum(jnp.minimum(r, g), b)
        eqc = maxc == minc
        cr = maxc - minc
        ones = jnp.ones_like(maxc)
        inv_max = 1.0 / jnp.where(eqc, ones, maxc)   # shared reciprocals
        inv_cr = 1.0 / jnp.where(eqc, ones, cr)
        s = cr * inv_max
        rc = (maxc - r) * inv_cr
        gc = (maxc - g) * inv_cr
        bc = (maxc - b) * inv_cr
        hr = jnp.where(maxc == r, bc - gc, 0.0)
        hg = jnp.where((maxc == g) & (maxc != r), 2.0 + rc - bc, 0.0)
        hb = jnp.where((maxc != g) & (maxc != r), 4.0 + gc - rc, 0.0)
        h = (hr + hg + hb) / 6.0 + 1.0
        h = h - jnp.floor(h)          # mod 1
        h = h + hue
        h = h - jnp.floor(h)          # mod 1
        v = maxc
        h6 = h * 6.0
        i6 = jnp.floor(h6)
        f = h6 - i6
        p = clamp01(v * (1.0 - s))
        q = clamp01(v * (1.0 - s * f))
        tt = clamp01(v * (1.0 - s * (1.0 - f)))

        def sel(c0, c1, c2, c3, c4, c5):
            return jnp.where(i6 == 0.0, c0,
                   jnp.where(i6 == 1.0, c1,
                   jnp.where(i6 == 2.0, c2,
                   jnp.where(i6 == 3.0, c3,
                   jnp.where(i6 == 4.0, c4, c5)))))

        r = sel(v, q, p, p, tt, v)
        g = sel(tt, v, v, q, p, p)
        b = sel(p, p, tt, v, v, q)

        # ---- RandomGrayscale (p=0.2, flag precomputed) ------------------------
        gray = GRAY_R * r + GRAY_G * g + GRAY_B * b
        r = gflag * gray + (1.0 - gflag) * r
        g = gflag * gray + (1.0 - gflag) * g
        b = gflag * gray + (1.0 - gflag) * b

        # ---- GaussianBlur(23, reflect pad; identity if skipped) ---------------
        jit_slab = jnp.concatenate([r, g, b], axis=1).astype(jnp.bfloat16)  # (S, C*S)
        t2 = jnp.dot(gy, jit_slab, preferred_element_type=jnp.float32)      # (S, C*S)
        out = jnp.dot(t2.astype(jnp.bfloat16), gxT,
                      preferred_element_type=jnp.float32)                   # (S, C*S)

        o_ref[i] = out
        return carry

    lax.fori_loop(0, tb, one_image, 0, unroll=True)


def augment_stage(x, params, wy, wxT_bd, gy, gxT_bd, *, tb=None):
    """x: (B, C, H, W) float32 in [0,1] -> (B, C, S, S) float32."""
    Bn = x.shape[0]
    S = INPUT_SIZE
    TB = tb if tb is not None else min(Bn, 8)
    assert Bn % TB == 0, (Bn, TB)

    # Channel-stacked input slab (B, H, C*W), bf16 for the MXU.
    x_slab = jnp.transpose(x, (0, 2, 1, 3)).reshape(Bn, H, C * W).astype(jnp.bfloat16)

    kernel = functools.partial(_augment_kernel, tb=TB)
    out = pl.pallas_call(
        kernel,
        out_shape=jax.ShapeDtypeStruct((Bn, S, C * S), jnp.float32),
        grid=(Bn // TB,),
        in_specs=[
            pl.BlockSpec(memory_space=pltpu.MemorySpace.SMEM),        # params (B,8)
            pl.BlockSpec((TB, H, C * W), lambda i: (i, 0, 0)),        # image slab
            pl.BlockSpec((TB, S, H), lambda i: (i, 0, 0)),            # Wy
            pl.BlockSpec((TB, C * W, C * S), lambda i: (i, 0, 0)),    # kron(I3, WxT)
            pl.BlockSpec((TB, S, S), lambda i: (i, 0, 0)),            # Gy
            pl.BlockSpec((TB, C * S, C * S), lambda i: (i, 0, 0)),    # kron(I3, GxT)
        ],
        out_specs=pl.BlockSpec((TB, S, C * S), lambda i: (i, 0, 0)),
        compiler_params=pltpu.CompilerParams(dimension_semantics=("parallel",)),
    )(params, x_slab, wy, wxT_bd, gy, gxT_bd)

    # (B, S, C*S) slab -> (B, C, S, S): pure wrapper-side layout plumbing.
    return jnp.transpose(out.reshape(Bn, S, C, S), (0, 2, 1, 3))


# ----------------------------------------------------------------------------
# Glue: deterministic "random" transform parameters and sampling matrices.
# ----------------------------------------------------------------------------
def _cubic_w(t, A=-0.75):                    # PyTorch bicubic kernel (a=-0.75)
    t = abs(float(t))
    if t <= 1.0:
        return (A + 2.0) * t ** 3 - (A + 3.0) * t ** 2 + 1.0
    if t < 2.0:
        return A * t ** 3 - 5.0 * A * t ** 2 + 8.0 * A * t - 4.0 * A
    return 0.0


def _bicubic_resize_matrix(in_len, out_len, offset, full_len):
    """(out_len, full_len): crop [offset, offset+in_len) then bicubic resize."""
    # TODO(synk): torchvision tensor Resize may use antialiased bicubic when
    # downscaling; plain (non-antialiased) bicubic sampling is used here.
    Wm = np.zeros((out_len, full_len), dtype=np.float32)
    scale = in_len / out_len
    for o in range(out_len):
        src = (o + 0.5) * scale - 0.5
        i0 = int(np.floor(src))
        frac = src - i0
        for k in range(-1, 3):
            idx = min(max(i0 + k, 0), in_len - 1)      # border clamp
            Wm[o, offset + idx] += _cubic_w(k - frac)
    return Wm


def _gaussian_blur_matrix(size, sigma, ksize=23):
    half = (ksize - 1) // 2
    xs = np.linspace(-half, half, ksize)
    pdf = np.exp(-0.5 * (xs / sigma) ** 2)
    k1d = (pdf / pdf.sum()).astype(np.float32)
    G = np.zeros((size, size), dtype=np.float32)
    for i in range(size):
        for tt in range(ksize):
            m = i + tt - half
            if m < 0:                # reflect padding
                m = -m
            if m >= size:
                m = 2 * (size - 1) - m
            G[i, m] += k1d[tt]
    return G


def _sample_params(rng, batch):
    S = INPUT_SIZE
    params = np.zeros((batch, 8), dtype=np.float32)
    wys, wxTs, gys, gxTs = [], [], [], []
    eye3 = np.eye(C, dtype=np.float32)
    for n in range(batch):
        # RandomResizedCrop(scale=(0.5, 1.0), ratio=(3/4, 4/3))
        area = H * W
        h_c, w_c, top, left = H, W, 0, 0
        for _ in range(10):
            target_area = area * rng.uniform(0.5, 1.0)
            ar = np.exp(rng.uniform(np.log(3.0 / 4.0), np.log(4.0 / 3.0)))
            w_try = int(round(np.sqrt(target_area * ar)))
            h_try = int(round(np.sqrt(target_area / ar)))
            if 0 < w_try <= W and 0 < h_try <= H:
                h_c, w_c = h_try, w_try
                top = rng.randint(0, H - h_c + 1)
                left = rng.randint(0, W - w_c + 1)
                break
        wy = _bicubic_resize_matrix(h_c, S, top, H)
        wx = _bicubic_resize_matrix(w_c, S, left, W)
        # RandomHorizontalFlip(p=0.5): fold column reversal into Wx
        if rng.uniform() < 0.5:
            wx = wx[::-1, :]
        wys.append(wy)
        wxTs.append(np.kron(eye3, np.ascontiguousarray(wx.T)))    # (3W, 3S) block-diag
        # ColorJitter(0.4, 0.4, 0.2, 0.1) under RandomApply(p=0.8)
        bright, contr, satur, hue = 1.0, 1.0, 1.0, 0.0
        if rng.uniform() < 0.8:
            bright = rng.uniform(0.6, 1.4)
            contr = rng.uniform(0.6, 1.4)
            satur = rng.uniform(0.8, 1.2)
            hue = rng.uniform(-0.1, 0.1)
        # RandomGrayscale(p=0.2)
        gflag = 1.0 if rng.uniform() < 0.2 else 0.0
        # GaussianBlur(23) under RandomApply(p=0.5), sigma ~ U(0.1, 2.0)
        if rng.uniform() < 0.5:
            G = _gaussian_blur_matrix(S, rng.uniform(0.1, 2.0))
        else:
            G = np.eye(S, dtype=np.float32)
        gys.append(G)
        gxTs.append(np.kron(eye3, np.ascontiguousarray(G.T)))     # (3S, 3S) block-diag
        params[n, :5] = [bright, contr, satur, hue, gflag]
    return (jnp.asarray(params),
            jnp.asarray(np.stack(wys), dtype=jnp.bfloat16),
            jnp.asarray(np.stack(wxTs), dtype=jnp.bfloat16),
            jnp.asarray(np.stack(gys), dtype=jnp.bfloat16),
            jnp.asarray(np.stack(gxTs), dtype=jnp.bfloat16))


if __name__ == "__main__":
    key = jax.random.PRNGKey(0)
    x = jax.random.uniform(key, (B, C, H, W), dtype=jnp.float32)   # images in [0,1]

    rng = np.random.RandomState(0)                                 # deterministic aug params
    params, wy, wxT_bd, gy, gxT_bd = _sample_params(rng, B)

    out = augment_stage(x, params, wy, wxT_bd, gy, gxT_bd)
    out = jax.block_until_ready(out)

    assert out.shape == (B, C, INPUT_SIZE, INPUT_SIZE), out.shape
    assert bool(jnp.all(jnp.isfinite(out)))
    print("KERNEL_OK")
</pallas_src>

<mosaic_0001>
module attributes {stable_mosaic.version = 11 : i64} {
  func.func @_augment_kernel(%arg0: i32, %arg1: memref<2x8xf32, #tpu.memory_space<smem>>, %arg2: memref<2x16x48xbf16, #tpu.memory_space<vmem>>, %arg3: memref<2x16x16xbf16, #tpu.memory_space<vmem>>, %arg4: memref<2x48x48xbf16, #tpu.memory_space<vmem>>, %arg5: memref<2x16x16xbf16, #tpu.memory_space<vmem>>, %arg6: memref<2x48x48xbf16, #tpu.memory_space<vmem>>, %arg7: memref<2x16x48xf32, #tpu.memory_space<vmem>>) attributes {dimension_semantics = [#tpu.dimension_semantics<parallel>], iteration_bounds = array<i64: 1>, scalar_prefetch = 0 : i64, scratch_operands = 0 : i64, tpu.core_type = #tpu.core_type<tc>, window_params = [{transform_indices = @transform_0, window_bounds = array<i64: 2, 8>}, {transform_indices = @transform_1, window_bounds = array<i64: 2, 16, 48>}, {transform_indices = @transform_2, window_bounds = array<i64: 2, 16, 16>}, {transform_indices = @transform_3, window_bounds = array<i64: 2, 48, 48>}, {transform_indices = @transform_4, window_bounds = array<i64: 2, 16, 16>}, {transform_indices = @transform_5, window_bounds = array<i64: 2, 48, 48>}, {transform_indices = @transform_6, window_bounds = array<i64: 2, 16, 48>}]} {
    %c0_i32 = arith.constant 0 : i32
    %c2_i32 = arith.constant 2 : i32
    %0 = arith.muli %arg0, %c2_i32 : i32
    %1 = arith.addi %0, %c0_i32 : i32
    %2 = arith.index_cast %1 : i32 to index
    %c0 = arith.constant 0 : index
    %3 = memref.load %arg1[%2, %c0] : memref<2x8xf32, #tpu.memory_space<smem>>
    %4 = arith.index_cast %1 : i32 to index
    %c1 = arith.constant 1 : index
    %5 = memref.load %arg1[%4, %c1] : memref<2x8xf32, #tpu.memory_space<smem>>
    %6 = arith.index_cast %1 : i32 to index
    %c2 = arith.constant 2 : index
    %7 = memref.load %arg1[%6, %c2] : memref<2x8xf32, #tpu.memory_space<smem>>
    %8 = arith.index_cast %1 : i32 to index
    %c3 = arith.constant 3 : index
    %9 = memref.load %arg1[%8, %c3] : memref<2x8xf32, #tpu.memory_space<smem>>
    %10 = arith.index_cast %1 : i32 to index
    %c4 = arith.constant 4 : index
    %11 = memref.load %arg1[%10, %c4] : memref<2x8xf32, #tpu.memory_space<smem>>
    %12 = arith.index_cast %c0_i32 : i32 to index
    %c0_0 = arith.constant 0 : index
    %c0_1 = arith.constant 0 : index
    %13 = vector.load %arg2[%12, %c0_0, %c0_1] : memref<2x16x48xbf16, #tpu.memory_space<vmem>>, vector<1x16x48xbf16>
    %14 = vector.shape_cast %13 : vector<1x16x48xbf16> to vector<16x48xbf16>
    %15 = arith.index_cast %c0_i32 : i32 to index
    %c0_2 = arith.constant 0 : index
    %c0_3 = arith.constant 0 : index
    %16 = vector.load %arg3[%15, %c0_2, %c0_3] : memref<2x16x16xbf16, #tpu.memory_space<vmem>>, vector<1x16x16xbf16>
    %17 = vector.shape_cast %16 : vector<1x16x16xbf16> to vector<16x16xbf16>
    %18 = arith.index_cast %c0_i32 : i32 to index
    %c0_4 = arith.constant 0 : index
    %c0_5 = arith.constant 0 : index
    %19 = vector.load %arg4[%18, %c0_4, %c0_5] : memref<2x48x48xbf16, #tpu.memory_space<vmem>>, vector<1x48x48xbf16>
    %20 = vector.shape_cast %19 : vector<1x48x48xbf16> to vector<48x48xbf16>
    %21 = arith.index_cast %c0_i32 : i32 to index
    %c0_6 = arith.constant 0 : index
    %c0_7 = arith.constant 0 : index
    %22 = vector.load %arg5[%21, %c0_6, %c0_7] : memref<2x16x16xbf16, #tpu.memory_space<vmem>>, vector<1x16x16xbf16>
    %23 = vector.shape_cast %22 : vector<1x16x16xbf16> to vector<16x16xbf16>
    %24 = arith.index_cast %c0_i32 : i32 to index
    %c0_8 = arith.constant 0 : index
    %c0_9 = arith.constant 0 : index
    %25 = vector.load %arg6[%24, %c0_8, %c0_9] : memref<2x48x48xbf16, #tpu.memory_space<vmem>>, vector<1x48x48xbf16>
    %26 = vector.shape_cast %25 : vector<1x48x48xbf16> to vector<48x48xbf16>
    %cst = arith.constant dense<0.000000e+00> : vector<16x48xf32>
    %27 = tpu.matmul %17, %14, %cst {dimension_numbers = #tpu.dot_dimension_numbers<[1], [0], [0], [1], [0, 0, 1, 1], [], []>} : vector<16x16xbf16>, vector<16x48xbf16>, vector<16x48xf32> -> vector<16x48xf32>
    %28 = arith.truncf %27 : vector<16x48xf32> to vector<16x48xbf16>
    %cst_10 = arith.constant dense<0.000000e+00> : vector<16x48xf32>
    %29 = tpu.matmul %28, %20, %cst_10 {dimension_numbers = #tpu.dot_dimension_numbers<[1], [0], [0], [1], [0, 0, 1, 1], [], []>} : vector<16x48xbf16>, vector<48x48xbf16>, vector<16x48xf32> -> vector<16x48xf32>
    %30 = vector.extract_strided_slice %29 {offsets = [0, 0], sizes = [16, 16], strides = [1, 1]} : vector<16x48xf32> to vector<16x16xf32>
    %31 = vector.extract_strided_slice %29 {offsets = [0, 16], sizes = [16, 16], strides = [1, 1]} : vector<16x48xf32> to vector<16x16xf32>
    %32 = vector.extract_strided_slice %29 {offsets = [0, 32], sizes = [16, 16], strides = [1, 1]} : vector<16x48xf32> to vector<16x16xf32>
    %33 = vector.broadcast %3 : f32 to vector<16x16xf32>
    %34 = arith.mulf %30, %33 : vector<16x16xf32>
    %cst_11 = arith.constant 0.000000e+00 : f32
    %cst_12 = arith.constant 1.000000e+00 : f32
    %35 = vector.broadcast %cst_11 : f32 to vector<16x16xf32>
    %36 = arith.maximumf %35, %34 : vector<16x16xf32>
    %37 = vector.broadcast %cst_12 : f32 to vector<16x16xf32>
    %38 = arith.minimumf %37, %36 : vector<16x16xf32>
    %39 = vector.broadcast %3 : f32 to vector<16x16xf32>
    %40 = arith.mulf %31, %39 : vector<16x16xf32>
    %cst_13 = arith.constant 0.000000e+00 : f32
    %cst_14 = arith.constant 1.000000e+00 : f32
    %41 = vector.broadcast %cst_13 : f32 to vector<16x16xf32>
    %42 = arith.maximumf %41, %40 : vector<16x16xf32>
    %43 = vector.broadcast %cst_14 : f32 to vector<16x16xf32>
    %44 = arith.minimumf %43, %42 : vector<16x16xf32>
    %45 = vector.broadcast %3 : f32 to vector<16x16xf32>
    %46 = arith.mulf %32, %45 : vector<16x16xf32>
    %cst_15 = arith.constant 0.000000e+00 : f32
    %cst_16 = arith.constant 1.000000e+00 : f32
    %47 = vector.broadcast %cst_15 : f32 to vector<16x16xf32>
    %48 = arith.maximumf %47, %46 : vector<16x16xf32>
    %49 = vector.broadcast %cst_16 : f32 to vector<16x16xf32>
    %50 = arith.minimumf %49, %48 : vector<16x16xf32>
    %cst_17 = arith.constant 2.989000e-01 : f32
    %51 = vector.broadcast %cst_17 : f32 to vector<16x16xf32>
    %52 = arith.mulf %51, %38 : vector<16x16xf32>
    %cst_18 = arith.constant 5.870000e-01 : f32
    %53 = vector.broadcast %cst_18 : f32 to vector<16x16xf32>
    %54 = arith.mulf %53, %44 : vector<16x16xf32>
    %55 = arith.addf %52, %54 : vector<16x16xf32>
    %cst_19 = arith.constant 1.140000e-01 : f32
    %56 = vector.broadcast %cst_19 : f32 to vector<16x16xf32>
    %57 = arith.mulf %56, %50 : vector<16x16xf32>
    %58 = arith.addf %55, %57 : vector<16x16xf32>
    %59 = vector.shape_cast %58 : vector<16x16xf32> to vector<1x16x16xf32>
    %cst_20 = arith.constant dense<0.000000e+00> : vector<1xf32>
    %60 = vector.multi_reduction <add>, %59, %cst_20 [1, 2] : vector<1x16x16xf32> to vector<1xf32>
    %61 = vector.shape_cast %60 : vector<1xf32> to vector<1x1x1xf32>
    %62 = vector.extract %61[0, 0, 0] : f32 from vector<1x1x1xf32>
    %cst_21 = arith.constant 2.560000e+02 : f32
    %63 = arith.divf %62, %cst_21 : f32
    %64 = vector.broadcast %5 : f32 to vector<16x16xf32>
    %65 = arith.mulf %64, %38 : vector<16x16xf32>
    %cst_22 = arith.constant 1.000000e+00 : f32
    %66 = arith.subf %cst_22, %5 : f32
    %67 = arith.mulf %66, %63 : f32
    %68 = vector.broadcast %67 : f32 to vector<16x16xf32>
    %69 = arith.addf %65, %68 : vector<16x16xf32>
    %cst_23 = arith.constant 0.000000e+00 : f32
    %cst_24 = arith.constant 1.000000e+00 : f32
    %70 = vector.broadcast %cst_23 : f32 to vector<16x16xf32>
    %71 = arith.maximumf %70, %69 : vector<16x16xf32>
    %72 = vector.broadcast %cst_24 : f32 to vector<16x16xf32>
    %73 = arith.minimumf %72, %71 : vector<16x16xf32>
    %74 = vector.broadcast %5 : f32 to vector<16x16xf32>
    %75 = arith.mulf %74, %44 : vector<16x16xf32>
    %cst_25 = arith.constant 1.000000e+00 : f32
    %76 = arith.subf %cst_25, %5 : f32
    %77 = arith.mulf %76, %63 : f32
    %78 = vector.broadcast %77 : f32 to vector<16x16xf32>
    %79 = arith.addf %75, %78 : vector<16x16xf32>
    %cst_26 = arith.constant 0.000000e+00 : f32
    %cst_27 = arith.constant 1.000000e+00 : f32
    %80 = vector.broadcast %cst_26 : f32 to vector<16x16xf32>
    %81 = arith.maximumf %80, %79 : vector<16x16xf32>
    %82 = vector.broadcast %cst_27 : f32 to vector<16x16xf32>
    %83 = arith.minimumf %82, %81 : vector<16x16xf32>
    %84 = vector.broadcast %5 : f32 to vector<16x16xf32>
    %85 = arith.mulf %84, %50 : vector<16x16xf32>
    %cst_28 = arith.constant 1.000000e+00 : f32
    %86 = arith.subf %cst_28, %5 : f32
    %87 = arith.mulf %86, %63 : f32
    %88 = vector.broadcast %87 : f32 to vector<16x16xf32>
    %89 = arith.addf %85, %88 : vector<16x16xf32>
    %cst_29 = arith.constant 0.000000e+00 : f32
    %cst_30 = arith.constant 1.000000e+00 : f32
    %90 = vector.broadcast %cst_29 : f32 to vector<16x16xf32>
    %91 = arith.maximumf %90, %89 : vector<16x16xf32>
    %92 = vector.broadcast %cst_30 : f32 to vector<16x16xf32>
    %93 = arith.minimumf %92, %91 : vector<16x16xf32>
    %cst_31 = arith.constant 2.989000e-01 : f32
    %94 = vector.broadcast %cst_31 : f32 to vector<16x16xf32>
    %95 = arith.mulf %94, %73 : vector<16x16xf32>
    %cst_32 = arith.constant 5.870000e-01 : f32
    %96 = vector.broadcast %cst_32 : f32 to vector<16x16xf32>
    %97 = arith.mulf %96, %83 : vector<16x16xf32>
    %98 = arith.addf %95, %97 : vector<16x16xf32>
    %cst_33 = arith.constant 1.140000e-01 : f32
    %99 = vector.broadcast %cst_33 : f32 to vector<16x16xf32>
    %100 = arith.mulf %99, %93 : vector<16x16xf32>
    %101 = arith.addf %98, %100 : vector<16x16xf32>
    %102 = vector.broadcast %7 : f32 to vector<16x16xf32>
    %103 = arith.mulf %102, %73 : vector<16x16xf32>
    %cst_34 = arith.constant 1.000000e+00 : f32
    %104 = arith.subf %cst_34, %7 : f32
    %105 = vector.broadcast %104 : f32 to vector<16x16xf32>
    %106 = arith.mulf %105, %101 : vector<16x16xf32>
    %107 = arith.addf %103, %106 : vector<16x16xf32>
    %cst_35 = arith.constant 0.000000e+00 : f32
    %cst_36 = arith.constant 1.000000e+00 : f32
    %108 = vector.broadcast %cst_35 : f32 to vector<16x16xf32>
    %109 = arith.maximumf %108, %107 : vector<16x16xf32>
    %110 = vector.broadcast %cst_36 : f32 to vector<16x16xf32>
    %111 = arith.minimumf %110, %109 : vector<16x16xf32>
    %112 = vector.broadcast %7 : f32 to vector<16x16xf32>
    %113 = arith.mulf %112, %83 : vector<16x16xf32>
    %cst_37 = arith.constant 1.000000e+00 : f32
    %114 = arith.subf %cst_37, %7 : f32
    %115 = vector.broadcast %114 : f32 to vector<16x16xf32>
    %116 = arith.mulf %115, %101 : vector<16x16xf32>
    %117 = arith.addf %113, %116 : vector<16x16xf32>
    %cst_38 = arith.constant 0.000000e+00 : f32
    %cst_39 = arith.constant 1.000000e+00 : f32
    %118 = vector.broadcast %cst_38 : f32 to vector<16x16xf32>
    %119 = arith.maximumf %118, %117 : vector<16x16xf32>
    %120 = vector.broadcast %cst_39 : f32 to vector<16x16xf32>
    %121 = arith.minimumf %120, %119 : vector<16x16xf32>
    %122 = vector.broadcast %7 : f32 to vector<16x16xf32>
    %123 = arith.mulf %122, %93 : vector<16x16xf32>
    %cst_40 = arith.constant 1.000000e+00 : f32
    %124 = arith.subf %cst_40, %7 : f32
    %125 = vector.broadcast %124 : f32 to vector<16x16xf32>
    %126 = arith.mulf %125, %101 : vector<16x16xf32>
    %127 = arith.addf %123, %126 : vector<16x16xf32>
    %cst_41 = arith.constant 0.000000e+00 : f32
    %cst_42 = arith.constant 1.000000e+00 : f32
    %128 = vector.broadcast %cst_41 : f32 to vector<16x16xf32>
    %129 = arith.maximumf %128, %127 : vector<16x16xf32>
    %130 = vector.broadcast %cst_42 : f32 to vector<16x16xf32>
    %131 = arith.minimumf %130, %129 : vector<16x16xf32>
    %132 = arith.maximumf %111, %121 : vector<16x16xf32>
    %133 = arith.maximumf %132, %131 : vector<16x16xf32>
    %134 = arith.minimumf %111, %121 : vector<16x16xf32>
    %135 = arith.minimumf %134, %131 : vector<16x16xf32>
    %136 = arith.cmpf oeq, %133, %135 : vector<16x16xf32>
    %137 = arith.subf %133, %135 : vector<16x16xf32>
    %cst_43 = arith.constant 1.000000e+00 : f32
    %138 = vector.broadcast %cst_43 : f32 to vector<16x16xf32>
    %139 = arith.select %136, %138, %133 : vector<16x16xi1>, vector<16x16xf32>
    %cst_44 = arith.constant 1.000000e+00 : f32
    %140 = vector.broadcast %cst_44 : f32 to vector<16x16xf32>
    %141 = arith.divf %140, %139 : vector<16x16xf32>
    %142 = arith.select %136, %138, %137 : vector<16x16xi1>, vector<16x16xf32>
    %cst_45 = arith.constant 1.000000e+00 : f32
    %143 = vector.broadcast %cst_45 : f32 to vector<16x16xf32>
    %144 = arith.divf %143, %142 : vector<16x16xf32>
    %145 = arith.mulf %137, %141 : vector<16x16xf32>
    %146 = arith.subf %133, %111 : vector<16x16xf32>
    %147 = arith.mulf %146, %144 : vector<16x16xf32>
    %148 = arith.subf %133, %121 : vector<16x16xf32>
    %149 = arith.mulf %148, %144 : vector<16x16xf32>
    %150 = arith.subf %133, %131 : vector<16x16xf32>
    %151 = arith.mulf %150, %144 : vector<16x16xf32>
    %152 = arith.cmpf oeq, %133, %111 : vector<16x16xf32>
    %153 = arith.subf %151, %149 : vector<16x16xf32>
    %cst_46 = arith.constant 0.000000e+00 : f32
    %154 = vector.broadcast %cst_46 : f32 to vector<16x16xf32>
    %155 = arith.select %152, %153, %154 : vector<16x16xi1>, vector<16x16xf32>
    %156 = arith.cmpf oeq, %133, %121 : vector<16x16xf32>
    %157 = arith.cmpf one, %133, %111 : vector<16x16xf32>
    %158 = arith.andi %156, %157 : vector<16x16xi1>
    %cst_47 = arith.constant 2.000000e+00 : f32
    %159 = vector.broadcast %cst_47 : f32 to vector<16x16xf32>
    %160 = arith.addf %159, %147 : vector<16x16xf32>
    %161 = arith.subf %160, %151 : vector<16x16xf32>
    %cst_48 = arith.constant 0.000000e+00 : f32
    %162 = vector.broadcast %cst_48 : f32 to vector<16x16xf32>
    %163 = arith.select %158, %161, %162 : vector<16x16xi1>, vector<16x16xf32>
    %164 = arith.cmpf one, %133, %121 : vector<16x16xf32>
    %165 = arith.cmpf one, %133, %111 : vector<16x16xf32>
    %166 = arith.andi %164, %165 : vector<16x16xi1>
    %cst_49 = arith.constant 4.000000e+00 : f32
    %167 = vector.broadcast %cst_49 : f32 to vector<16x16xf32>
    %168 = arith.addf %167, %149 : vector<16x16xf32>
    %169 = arith.subf %168, %147 : vector<16x16xf32>
    %cst_50 = arith.constant 0.000000e+00 : f32
    %170 = vector.broadcast %cst_50 : f32 to vector<16x16xf32>
    %171 = arith.select %166, %169, %170 : vector<16x16xi1>, vector<16x16xf32>
    %172 = arith.addf %155, %163 : vector<16x16xf32>
    %173 = arith.addf %172, %171 : vector<16x16xf32>
    %cst_51 = arith.constant 6.000000e+00 : f32
    %174 = vector.broadcast %cst_51 : f32 to vector<16x16xf32>
    %175 = arith.divf %173, %174 : vector<16x16xf32>
    %cst_52 = arith.constant 1.000000e+00 : f32
    %176 = vector.broadcast %cst_52 : f32 to vector<16x16xf32>
    %177 = arith.addf %175, %176 : vector<16x16xf32>
    %178 = math.floor %177 : vector<16x16xf32>
    %179 = arith.subf %177, %178 : vector<16x16xf32>
    %180 = vector.broadcast %9 : f32 to vector<16x16xf32>
    %181 = arith.addf %179, %180 : vector<16x16xf32>
    %182 = math.floor %181 : vector<16x16xf32>
    %183 = arith.subf %181, %182 : vector<16x16xf32>
    %cst_53 = arith.constant 6.000000e+00 : f32
    %184 = vector.broadcast %cst_53 : f32 to vector<16x16xf32>
    %185 = arith.mulf %183, %184 : vector<16x16xf32>
    %186 = math.floor %185 : vector<16x16xf32>
    %187 = arith.subf %185, %186 : vector<16x16xf32>
    %cst_54 = arith.constant 1.000000e+00 : f32
    %188 = vector.broadcast %cst_54 : f32 to vector<16x16xf32>
    %189 = arith.subf %188, %145 : vector<16x16xf32>
    %190 = arith.mulf %133, %189 : vector<16x16xf32>
    %cst_55 = arith.constant 0.000000e+00 : f32
    %cst_56 = arith.constant 1.000000e+00 : f32
    %191 = vector.broadcast %cst_55 : f32 to vector<16x16xf32>
    %192 = arith.maximumf %191, %190 : vector<16x16xf32>
    %193 = vector.broadcast %cst_56 : f32 to vector<16x16xf32>
    %194 = arith.minimumf %193, %192 : vector<16x16xf32>
    %195 = arith.mulf %145, %187 : vector<16x16xf32>
    %cst_57 = arith.constant 1.000000e+00 : f32
    %196 = vector.broadcast %cst_57 : f32 to vector<16x16xf32>
    %197 = arith.subf %196, %195 : vector<16x16xf32>
    %198 = arith.mulf %133, %197 : vector<16x16xf32>
    %cst_58 = arith.constant 0.000000e+00 : f32
    %cst_59 = arith.constant 1.000000e+00 : f32
    %199 = vector.broadcast %cst_58 : f32 to vector<16x16xf32>
    %200 = arith.maximumf %199, %198 : vector<16x16xf32>
    %201 = vector.broadcast %cst_59 : f32 to vector<16x16xf32>
    %202 = arith.minimumf %201, %200 : vector<16x16xf32>
    %cst_60 = arith.constant 1.000000e+00 : f32
    %203 = vector.broadcast %cst_60 : f32 to vector<16x16xf32>
    %204 = arith.subf %203, %187 : vector<16x16xf32>
    %205 = arith.mulf %145, %204 : vector<16x16xf32>
    %cst_61 = arith.constant 1.000000e+00 : f32
    %206 = vector.broadcast %cst_61 : f32 to vector<16x16xf32>
    %207 = arith.subf %206, %205 : vector<16x16xf32>
    %208 = arith.mulf %133, %207 : vector<16x16xf32>
    %cst_62 = arith.constant 0.000000e+00 : f32
    %cst_63 = arith.constant 1.000000e+00 : f32
    %209 = vector.broadcast %cst_62 : f32 to vector<16x16xf32>
    %210 = arith.maximumf %209, %208 : vector<16x16xf32>
    %211 = vector.broadcast %cst_63 : f32 to vector<16x16xf32>
    %212 = arith.minimumf %211, %210 : vector<16x16xf32>
    %cst_64 = arith.constant 0.000000e+00 : f32
    %213 = vector.broadcast %cst_64 : f32 to vector<16x16xf32>
    %214 = arith.cmpf oeq, %186, %213 : vector<16x16xf32>
    %cst_65 = arith.constant 1.000000e+00 : f32
    %215 = vector.broadcast %cst_65 : f32 to vector<16x16xf32>
    %216 = arith.cmpf oeq, %186, %215 : vector<16x16xf32>
    %cst_66 = arith.constant 2.000000e+00 : f32
    %217 = vector.broadcast %cst_66 : f32 to vector<16x16xf32>
    %218 = arith.cmpf oeq, %186, %217 : vector<16x16xf32>
    %cst_67 = arith.constant 3.000000e+00 : f32
    %219 = vector.broadcast %cst_67 : f32 to vector<16x16xf32>
    %220 = arith.cmpf oeq, %186, %219 : vector<16x16xf32>
    %cst_68 = arith.constant 4.000000e+00 : f32
    %221 = vector.broadcast %cst_68 : f32 to vector<16x16xf32>
    %222 = arith.cmpf oeq, %186, %221 : vector<16x16xf32>
    %223 = arith.select %222, %212, %133 : vector<16x16xi1>, vector<16x16xf32>
    %224 = arith.select %220, %194, %223 : vector<16x16xi1>, vector<16x16xf32>
    %225 = arith.select %218, %194, %224 : vector<16x16xi1>, vector<16x16xf32>
    %226 = arith.select %216, %202, %225 : vector<16x16xi1>, vector<16x16xf32>
    %227 = arith.select %214, %133, %226 : vector<16x16xi1>, vector<16x16xf32>
    %cst_69 = arith.constant 0.000000e+00 : f32
    %228 = vector.broadcast %cst_69 : f32 to vector<16x16xf32>
    %229 = arith.cmpf oeq, %186, %228 : vector<16x16xf32>
    %cst_70 = arith.constant 1.000000e+00 : f32
    %230 = vector.broadcast %cst_70 : f32 to vector<16x16xf32>
    %231 = arith.cmpf oeq, %186, %230 : vector<16x16xf32>
    %cst_71 = arith.constant 2.000000e+00 : f32
    %232 = vector.broadcast %cst_71 : f32 to vector<16x16xf32>
    %233 = arith.cmpf oeq, %186, %232 : vector<16x16xf32>
    %cst_72 = arith.constant 3.000000e+00 : f32
    %234 = vector.broadcast %cst_72 : f32 to vector<16x16xf32>
    %235 = arith.cmpf oeq, %186, %234 : vector<16x16xf32>
    %cst_73 = arith.constant 4.000000e+00 : f32
    %236 = vector.broadcast %cst_73 : f32 to vector<16x16xf32>
    %237 = arith.cmpf oeq, %186, %236 : vector<16x16xf32>
    %238 = arith.select %237, %194, %194 : vector<16x16xi1>, vector<16x16xf32>
    %239 = arith.select %235, %202, %238 : vector<16x16xi1>, vector<16x16xf32>
    %240 = arith.select %233, %133, %239 : vector<16x16xi1>, vector<16x16xf32>
    %241 = arith.select %231, %133, %240 : vector<16x16xi1>, vector<16x16xf32>
    %242 = arith.select %229, %212, %241 : vector<16x16xi1>, vector<16x16xf32>
    %cst_74 = arith.constant 0.000000e+00 : f32
    %243 = vector.broadcast %cst_74 : f32 to vector<16x16xf32>
    %244 = arith.cmpf oeq, %186, %243 : vector<16x16xf32>
    %cst_75 = arith.constant 1.000000e+00 : f32
    %245 = vector.broadcast %cst_75 : f32 to vector<16x16xf32>
    %246 = arith.cmpf oeq, %186, %245 : vector<16x16xf32>
    %cst_76 = arith.constant 2.000000e+00 : f32
    %247 = vector.broadcast %cst_76 : f32 to vector<16x16xf32>
    %248 = arith.cmpf oeq, %186, %247 : vector<16x16xf32>
    %cst_77 = arith.constant 3.000000e+00 : f32
    %249 = vector.broadcast %cst_77 : f32 to vector<16x16xf32>
    %250 = arith.cmpf oeq, %186, %249 : vector<16x16xf32>
    %cst_78 = arith.constant 4.000000e+00 : f32
    %251 = vector.broadcast %cst_78 : f32 to vector<16x16xf32>
    %252 = arith.cmpf oeq, %186, %251 : vector<16x16xf32>
    %253 = arith.select %252, %133, %202 : vector<16x16xi1>, vector<16x16xf32>
    %254 = arith.select %250, %133, %253 : vector<16x16xi1>, vector<16x16xf32>
    %255 = arith.select %248, %212, %254 : vector<16x16xi1>, vector<16x16xf32>
    %256 = arith.select %246, %194, %255 : vector<16x16xi1>, vector<16x16xf32>
    %257 = arith.select %244, %194, %256 : vector<16x16xi1>, vector<16x16xf32>
    %cst_79 = arith.constant 2.989000e-01 : f32
    %258 = vector.broadcast %cst_79 : f32 to vector<16x16xf32>
    %259 = arith.mulf %258, %227 : vector<16x16xf32>
    %cst_80 = arith.constant 5.870000e-01 : f32
    %260 = vector.broadcast %cst_80 : f32 to vector<16x16xf32>
    %261 = arith.mulf %260, %242 : vector<16x16xf32>
    %262 = arith.addf %259, %261 : vector<16x16xf32>
    %cst_81 = arith.constant 1.140000e-01 : f32
    %263 = vector.broadcast %cst_81 : f32 to vector<16x16xf32>
    %264 = arith.mulf %263, %257 : vector<16x16xf32>
    %265 = arith.addf %262, %264 : vector<16x16xf32>
    %266 = vector.broadcast %11 : f32 to vector<16x16xf32>
    %267 = arith.mulf %266, %265 : vector<16x16xf32>
    %cst_82 = arith.constant 1.000000e+00 : f32
    %268 = arith.subf %cst_82, %11 : f32
    %269 = vector.broadcast %268 : f32 to vector<16x16xf32>
    %270 = arith.mulf %269, %227 : vector<16x16xf32>
    %271 = arith.addf %267, %270 : vector<16x16xf32>
    %272 = vector.broadcast %11 : f32 to vector<16x16xf32>
    %273 = arith.mulf %272, %265 : vector<16x16xf32>
    %cst_83 = arith.constant 1.000000e+00 : f32
    %274 = arith.subf %cst_83, %11 : f32
    %275 = vector.broadcast %274 : f32 to vector<16x16xf32>
    %276 = arith.mulf %275, %242 : vector<16x16xf32>
    %277 = arith.addf %273, %276 : vector<16x16xf32>
    %278 = vector.broadcast %11 : f32 to vector<16x16xf32>
    %279 = arith.mulf %278, %265 : vector<16x16xf32>
    %cst_84 = arith.constant 1.000000e+00 : f32
    %280 = arith.subf %cst_84, %11 : f32
    %281 = vector.broadcast %280 : f32 to vector<16x16xf32>
    %282 = arith.mulf %281, %257 : vector<16x16xf32>
    %283 = arith.addf %279, %282 : vector<16x16xf32>
    %284 = tpu.concatenate %271, %277, %283 in 1 : vector<16x16xf32>, vector<16x16xf32>, vector<16x16xf32> -> vector<16x48xf32>
    %285 = arith.truncf %284 : vector<16x48xf32> to vector<16x48xbf16>
    %cst_85 = arith.constant dense<0.000000e+00> : vector<16x48xf32>
    %286 = tpu.matmul %23, %285, %cst_85 {dimension_numbers = #tpu.dot_dimension_numbers<[1], [0], [0], [1], [0, 0, 1, 1], [], []>} : vector<16x16xbf16>, vector<16x48xbf16>, vector<16x48xf32> -> vector<16x48xf32>
    %287 = arith.truncf %286 : vector<16x48xf32> to vector<16x48xbf16>
    %cst_86 = arith.constant dense<0.000000e+00> : vector<16x48xf32>
    %288 = tpu.matmul %287, %26, %cst_86 {dimension_numbers = #tpu.dot_dimension_numbers<[1], [0], [0], [1], [0, 0, 1, 1], [], []>} : vector<16x48xbf16>, vector<48x48xbf16>, vector<16x48xf32> -> vector<16x48xf32>
    %289 = arith.index_cast %c0_i32 : i32 to index
    %c0_87 = arith.constant 0 : index
    %c0_88 = arith.constant 0 : index
    %290 = vector.load %arg7[%289, %c0_87, %c0_88] : memref<2x16x48xf32, #tpu.memory_space<vmem>>, vector<1x16x48xf32>
    %291 = vector.shape_cast %290 : vector<1x16x48xf32> to vector<16x48xf32>
    %292 = vector.shape_cast %288 : vector<16x48xf32> to vector<1x16x48xf32>
    tpu.vector_store %arg7[%289, %c0_87, %c0_88], %292 {strides = array<i32>} : memref<2x16x48xf32, #tpu.memory_space<vmem>>, vector<1x16x48xf32>,
    %c1_i32 = arith.constant 1 : i32
    %c2_i32_89 = arith.constant 2 : i32
    %293 = arith.muli %arg0, %c2_i32_89 : i32
    %294 = arith.addi %293, %c1_i32 : i32
    %295 = arith.index_cast %294 : i32 to index
    %c0_90 = arith.constant 0 : index
    %296 = memref.load %arg1[%295, %c0_90] : memref<2x8xf32, #tpu.memory_space<smem>>
    %297 = arith.index_cast %294 : i32 to index
    %c1_91 = arith.constant 1 : index
    %298 = memref.load %arg1[%297, %c1_91] : memref<2x8xf32, #tpu.memory_space<smem>>
    %299 = arith.index_cast %294 : i32 to index
    %c2_92 = arith.constant 2 : index
    %300 = memref.load %arg1[%299, %c2_92] : memref<2x8xf32, #tpu.memory_space<smem>>
    %301 = arith.index_cast %294 : i32 to index
    %c3_93 = arith.constant 3 : index
    %302 = memref.load %arg1[%301, %c3_93] : memref<2x8xf32, #tpu.memory_space<smem>>
    %303 = arith.index_cast %294 : i32 to index
    %c4_94 = arith.constant 4 : index
    %304 = memref.load %arg1[%303, %c4_94] : memref<2x8xf32, #tpu.memory_space<smem>>
    %305 = arith.index_cast %c1_i32 : i32 to index
    %c0_95 = arith.constant 0 : index
    %c0_96 = arith.constant 0 : index
    %306 = vector.load %arg2[%305, %c0_95, %c0_96] : memref<2x16x48xbf16, #tpu.memory_space<vmem>>, vector<1x16x48xbf16>
    %307 = vector.shape_cast %306 : vector<1x16x48xbf16> to vector<16x48xbf16>
    %308 = arith.index_cast %c1_i32 : i32 to index
    %c0_97 = arith.constant 0 : index
    %c0_98 = arith.constant 0 : index
    %309 = vector.load %arg3[%308, %c0_97, %c0_98] : memref<2x16x16xbf16, #tpu.memory_space<vmem>>, vector<1x16x16xbf16>
    %310 = vector.shape_cast %309 : vector<1x16x16xbf16> to vector<16x16xbf16>
    %311 = arith.index_cast %c1_i32 : i32 to index
    %c0_99 = arith.constant 0 : index
    %c0_100 = arith.constant 0 : index
    %312 = vector.load %arg4[%311, %c0_99, %c0_100] : memref<2x48x48xbf16, #tpu.memory_space<vmem>>, vector<1x48x48xbf16>
    %313 = vector.shape_cast %312 : vector<1x48x48xbf16> to vector<48x48xbf16>
    %314 = arith.index_cast %c1_i32 : i32 to index
    %c0_101 = arith.constant 0 : index
    %c0_102 = arith.constant 0 : index
    %315 = vector.load %arg5[%314, %c0_101, %c0_102] : memref<2x16x16xbf16, #tpu.memory_space<vmem>>, vector<1x16x16xbf16>
    %316 = vector.shape_cast %315 : vector<1x16x16xbf16> to vector<16x16xbf16>
    %317 = arith.index_cast %c1_i32 : i32 to index
    %c0_103 = arith.constant 0 : index
    %c0_104 = arith.constant 0 : index
    %318 = vector.load %arg6[%317, %c0_103, %c0_104] : memref<2x48x48xbf16, #tpu.memory_space<vmem>>, vector<1x48x48xbf16>
    %319 = vector.shape_cast %318 : vector<1x48x48xbf16> to vector<48x48xbf16>
    %cst_105 = arith.constant dense<0.000000e+00> : vector<16x48xf32>
    %320 = tpu.matmul %310, %307, %cst_105 {dimension_numbers = #tpu.dot_dimension_numbers<[1], [0], [0], [1], [0, 0, 1, 1], [], []>} : vector<16x16xbf16>, vector<16x48xbf16>, vector<16x48xf32> -> vector<16x48xf32>
    %321 = arith.truncf %320 : vector<16x48xf32> to vector<16x48xbf16>
    %cst_106 = arith.constant dense<0.000000e+00> : vector<16x48xf32>
    %322 = tpu.matmul %321, %313, %cst_106 {dimension_numbers = #tpu.dot_dimension_numbers<[1], [0], [0], [1], [0, 0, 1, 1], [], []>} : vector<16x48xbf16>, vector<48x48xbf16>, vector<16x48xf32> -> vector<16x48xf32>
    %323 = vector.extract_strided_slice %322 {offsets = [0, 0], sizes = [16, 16], strides = [1, 1]} : vector<16x48xf32> to vector<16x16xf32>
    %324 = vector.extract_strided_slice %322 {offsets = [0, 16], sizes = [16, 16], strides = [1, 1]} : vector<16x48xf32> to vector<16x16xf32>
    %325 = vector.extract_strided_slice %322 {offsets = [0, 32], sizes = [16, 16], strides = [1, 1]} : vector<16x48xf32> to vector<16x16xf32>
    %326 = vector.broadcast %296 : f32 to vector<16x16xf32>
    %327 = arith.mulf %323, %326 : vector<16x16xf32>
    %cst_107 = arith.constant 0.000000e+00 : f32
    %cst_108 = arith.constant 1.000000e+00 : f32
    %328 = vector.broadcast %cst_107 : f32 to vector<16x16xf32>
    %329 = arith.maximumf %328, %327 : vector<16x16xf32>
    %330 = vector.broadcast %cst_108 : f32 to vector<16x16xf32>
    %331 = arith.minimumf %330, %329 : vector<16x16xf32>
    %332 = vector.broadcast %296 : f32 to vector<16x16xf32>
    %333 = arith.mulf %324, %332 : vector<16x16xf32>
    %cst_109 = arith.constant 0.000000e+00 : f32
    %cst_110 = arith.constant 1.000000e+00 : f32
    %334 = vector.broadcast %cst_109 : f32 to vector<16x16xf32>
    %335 = arith.maximumf %334, %333 : vector<16x16xf32>
    %336 = vector.broadcast %cst_110 : f32 to vector<16x16xf32>
    %337 = arith.minimumf %336, %335 : vector<16x16xf32>
    %338 = vector.broadcast %296 : f32 to vector<16x16xf32>
    %339 = arith.mulf %325, %338 : vector<16x16xf32>
    %cst_111 = arith.constant 0.000000e+00 : f32
    %cst_112 = arith.constant 1.000000e+00 : f32
    %340 = vector.broadcast %cst_111 : f32 to vector<16x16xf32>
    %341 = arith.maximumf %340, %339 : vector<16x16xf32>
    %342 = vector.broadcast %cst_112 : f32 to vector<16x16xf32>
    %343 = arith.minimumf %342, %341 : vector<16x16xf32>
    %cst_113 = arith.constant 2.989000e-01 : f32
    %344 = vector.broadcast %cst_113 : f32 to vector<16x16xf32>
    %345 = arith.mulf %344, %331 : vector<16x16xf32>
    %cst_114 = arith.constant 5.870000e-01 : f32
    %346 = vector.broadcast %cst_114 : f32 to vector<16x16xf32>
    %347 = arith.mulf %346, %337 : vector<16x16xf32>
    %348 = arith.addf %345, %347 : vector<16x16xf32>
    %cst_115 = arith.constant 1.140000e-01 : f32
    %349 = vector.broadcast %cst_115 : f32 to vector<16x16xf32>
    %350 = arith.mulf %349, %343 : vector<16x16xf32>
    %351 = arith.addf %348, %350 : vector<16x16xf32>
    %352 = vector.shape_cast %351 : vector<16x16xf32> to vector<1x16x16xf32>
    %cst_116 = arith.constant dense<0.000000e+00> : vector<1xf32>
    %353 = vector.multi_reduction <add>, %352, %cst_116 [1, 2] : vector<1x16x16xf32> to vector<1xf32>
    %354 = vector.shape_cast %353 : vector<1xf32> to vector<1x1x1xf32>
    %355 = vector.extract %354[0, 0, 0] : f32 from vector<1x1x1xf32>
    %cst_117 = arith.constant 2.560000e+02 : f32
    %356 = arith.divf %355, %cst_117 : f32
    %357 = vector.broadcast %298 : f32 to vector<16x16xf32>
    %358 = arith.mulf %357, %331 : vector<16x16xf32>
    %cst_118 = arith.constant 1.000000e+00 : f32
    %359 = arith.subf %cst_118, %298 : f32
    %360 = arith.mulf %359, %356 : f32
    %361 = vector.broadcast %360 : f32 to vector<16x16xf32>
    %362 = arith.addf %358, %361 : vector<16x16xf32>
    %cst_119 = arith.constant 0.000000e+00 : f32
    %cst_120 = arith.constant 1.000000e+00 : f32
    %363 = vector.broadcast %cst_119 : f32 to vector<16x16xf32>
    %364 = arith.maximumf %363, %362 : vector<16x16xf32>
    %365 = vector.broadcast %cst_120 : f32 to vector<16x16xf32>
    %366 = arith.minimumf %365, %364 : vector<16x16xf32>
    %367 = vector.broadcast %298 : f32 to vector<16x16xf32>
    %368 = arith.mulf %367, %337 : vector<16x16xf32>
    %cst_121 = arith.constant 1.000000e+00 : f32
    %369 = arith.subf %cst_121, %298 : f32
    %370 = arith.mulf %369, %356 : f32
    %371 = vector.broadcast %370 : f32 to vector<16x16xf32>
    %372 = arith.addf %368, %371 : vector<16x16xf32>
    %cst_122 = arith.constant 0.000000e+00 : f32
    %cst_123 = arith.constant 1.000000e+00 : f32
    %373 = vector.broadcast %cst_122 : f32 to vector<16x16xf32>
    %374 = arith.maximumf %373, %372 : vector<16x16xf32>
    %375 = vector.broadcast %cst_123 : f32 to vector<16x16xf32>
    %376 = arith.minimumf %375, %374 : vector<16x16xf32>
    %377 = vector.broadcast %298 : f32 to vector<16x16xf32>
    %378 = arith.mulf %377, %343 : vector<16x16xf32>
    %cst_124 = arith.constant 1.000000e+00 : f32
    %379 = arith.subf %cst_124, %298 : f32
    %380 = arith.mulf %379, %356 : f32
    %381 = vector.broadcast %380 : f32 to vector<16x16xf32>
    %382 = arith.addf %378, %381 : vector<16x16xf32>
    %cst_125 = arith.constant 0.000000e+00 : f32
    %cst_126 = arith.constant 1.000000e+00 : f32
    %383 = vector.broadcast %cst_125 : f32 to vector<16x16xf32>
    %384 = arith.maximumf %383, %382 : vector<16x16xf32>
    %385 = vector.broadcast %cst_126 : f32 to vector<16x16xf32>
    %386 = arith.minimumf %385, %384 : vector<16x16xf32>
    %cst_127 = arith.constant 2.989000e-01 : f32
    %387 = vector.broadcast %cst_127 : f32 to vector<16x16xf32>
    %388 = arith.mulf %387, %366 : vector<16x16xf32>
    %cst_128 = arith.constant 5.870000e-01 : f32
    %389 = vector.broadcast %cst_128 : f32 to vector<16x16xf32>
    %390 = arith.mulf %389, %376 : vector<16x16xf32>
    %391 = arith.addf %388, %390 : vector<16x16xf32>
    %cst_129 = arith.constant 1.140000e-01 : f32
    %392 = vector.broadcast %cst_129 : f32 to vector<16x16xf32>
    %393 = arith.mulf %392, %386 : vector<16x16xf32>
    %394 = arith.addf %391, %393 : vector<16x16xf32>
    %395 = vector.broadcast %300 : f32 to vector<16x16xf32>
    %396 = arith.mulf %395, %366 : vector<16x16xf32>
    %cst_130 = arith.constant 1.000000e+00 : f32
    %397 = arith.subf %cst_130, %300 : f32
    %398 = vector.broadcast %397 : f32 to vector<16x16xf32>
    %399 = arith.mulf %398, %394 : vector<16x16xf32>
    %400 = arith.addf %396, %399 : vector<16x16xf32>
    %cst_131 = arith.constant 0.000000e+00 : f32
    %cst_132 = arith.constant 1.000000e+00 : f32
    %401 = vector.broadcast %cst_131 : f32 to vector<16x16xf32>
    %402 = arith.maximumf %401, %400 : vector<16x16xf32>
    %403 = vector.broadcast %cst_132 : f32 to vector<16x16xf32>
    %404 = arith.minimumf %403, %402 : vector<16x16xf32>
    %405 = vector.broadcast %300 : f32 to vector<16x16xf32>
    %406 = arith.mulf %405, %376 : vector<16x16xf32>
    %cst_133 = arith.constant 1.000000e+00 : f32
    %407 = arith.subf %cst_133, %300 : f32
    %408 = vector.broadcast %407 : f32 to vector<16x16xf32>
    %409 = arith.mulf %408, %394 : vector<16x16xf32>
    %410 = arith.addf %406, %409 : vector<16x16xf32>
    %cst_134 = arith.constant 0.000000e+00 : f32
    %cst_135 = arith.constant 1.000000e+00 : f32
    %411 = vector.broadcast %cst_134 : f32 to vector<16x16xf32>
    %412 = arith.maximumf %411, %410 : vector<16x16xf32>
    %413 = vector.broadcast %cst_135 : f32 to vector<16x16xf32>
    %414 = arith.minimumf %413, %412 : vector<16x16xf32>
    %415 = vector.broadcast %300 : f32 to vector<16x16xf32>
    %416 = arith.mulf %415, %386 : vector<16x16xf32>
    %cst_136 = arith.constant 1.000000e+00 : f32
    %417 = arith.subf %cst_136, %300 : f32
    %418 = vector.broadcast %417 : f32 to vector<16x16xf32>
    %419 = arith.mulf %418, %394 : vector<16x16xf32>
    %420 = arith.addf %416, %419 : vector<16x16xf32>
    %cst_137 = arith.constant 0.000000e+00 : f32
    %cst_138 = arith.constant 1.000000e+00 : f32
    %421 = vector.broadcast %cst_137 : f32 to vector<16x16xf32>
    %422 = arith.maximumf %421, %420 : vector<16x16xf32>
    %423 = vector.broadcast %cst_138 : f32 to vector<16x16xf32>
    %424 = arith.minimumf %423, %422 : vector<16x16xf32>
    %425 = arith.maximumf %404, %414 : vector<16x16xf32>
    %426 = arith.maximumf %425, %424 : vector<16x16xf32>
    %427 = arith.minimumf %404, %414 : vector<16x16xf32>
    %428 = arith.minimumf %427, %424 : vector<16x16xf32>
    %429 = arith.cmpf oeq, %426, %428 : vector<16x16xf32>
    %430 = arith.subf %426, %428 : vector<16x16xf32>
    %cst_139 = arith.constant 1.000000e+00 : f32
    %431 = vector.broadcast %cst_139 : f32 to vector<16x16xf32>
    %432 = arith.select %429, %431, %426 : vector<16x16xi1>, vector<16x16xf32>
    %cst_140 = arith.constant 1.000000e+00 : f32
    %433 = vector.broadcast %cst_140 : f32 to vector<16x16xf32>
    %434 = arith.divf %433, %432 : vector<16x16xf32>
    %435 = arith.select %429, %431, %430 : vector<16x16xi1>, vector<16x16xf32>
    %cst_141 = arith.constant 1.000000e+00 : f32
    %436 = vector.broadcast %cst_141 : f32 to vector<16x16xf32>
    %437 = arith.divf %436, %435 : vector<16x16xf32>
    %438 = arith.mulf %430, %434 : vector<16x16xf32>
    %439 = arith.subf %426, %404 : vector<16x16xf32>
    %440 = arith.mulf %439, %437 : vector<16x16xf32>
    %441 = arith.subf %426, %414 : vector<16x16xf32>
    %442 = arith.mulf %441, %437 : vector<16x16xf32>
    %443 = arith.subf %426, %424 : vector<16x16xf32>
    %444 = arith.mulf %443, %437 : vector<16x16xf32>
    %445 = arith.cmpf oeq, %426, %404 : vector<16x16xf32>
    %446 = arith.subf %444, %442 : vector<16x16xf32>
    %cst_142 = arith.constant 0.000000e+00 : f32
    %447 = vector.broadcast %cst_142 : f32 to vector<16x16xf32>
    %448 = arith.select %445, %446, %447 : vector<16x16xi1>, vector<16x16xf32>
    %449 = arith.cmpf oeq, %426, %414 : vector<16x16xf32>
    %450 = arith.cmpf one, %426, %404 : vector<16x16xf32>
    %451 = arith.andi %449, %450 : vector<16x16xi1>
    %cst_143 = arith.constant 2.000000e+00 : f32
    %452 = vector.broadcast %cst_143 : f32 to vector<16x16xf32>
    %453 = arith.addf %452, %440 : vector<16x16xf32>
    %454 = arith.subf %453, %444 : vector<16x16xf32>
    %cst_144 = arith.constant 0.000000e+00 : f32
    %455 = vector.broadcast %cst_144 : f32 to vector<16x16xf32>
    %456 = arith.select %451, %454, %455 : vector<16x16xi1>, vector<16x16xf32>
    %457 = arith.cmpf one, %426, %414 : vector<16x16xf32>
    %458 = arith.cmpf one, %426, %404 : vector<16x16xf32>
    %459 = arith.andi %457, %458 : vector<16x16xi1>
    %cst_145 = arith.constant 4.000000e+00 : f32
    %460 = vector.broadcast %cst_145 : f32 to vector<16x16xf32>
    %461 = arith.addf %460, %442 : vector<16x16xf32>
    %462 = arith.subf %461, %440 : vector<16x16xf32>
    %cst_146 = arith.constant 0.000000e+00 : f32
    %463 = vector.broadcast %cst_146 : f32 to vector<16x16xf32>
    %464 = arith.select %459, %462, %463 : vector<16x16xi1>, vector<16x16xf32>
    %465 = arith.addf %448, %456 : vector<16x16xf32>
    %466 = arith.addf %465, %464 : vector<16x16xf32>
    %cst_147 = arith.constant 6.000000e+00 : f32
    %467 = vector.broadcast %cst_147 : f32 to vector<16x16xf32>
    %468 = arith.divf %466, %467 : vector<16x16xf32>
    %cst_148 = arith.constant 1.000000e+00 : f32
    %469 = vector.broadcast %cst_148 : f32 to vector<16x16xf32>
    %470 = arith.addf %468, %469 : vector<16x16xf32>
    %471 = math.floor %470 : vector<16x16xf32>
    %472 = arith.subf %470, %471 : vector<16x16xf32>
    %473 = vector.broadcast %302 : f32 to vector<16x16xf32>
    %474 = arith.addf %472, %473 : vector<16x16xf32>
    %475 = math.floor %474 : vector<16x16xf32>
    %476 = arith.subf %474, %475 : vector<16x16xf32>
    %cst_149 = arith.constant 6.000000e+00 : f32
    %477 = vector.broadcast %cst_149 : f32 to vector<16x16xf32>
    %478 = arith.mulf %476, %477 : vector<16x16xf32>
    %479 = math.floor %478 : vector<16x16xf32>
    %480 = arith.subf %478, %479 : vector<16x16xf32>
    %cst_150 = arith.constant 1.000000e+00 : f32
    %481 = vector.broadcast %cst_150 : f32 to vector<16x16xf32>
    %482 = arith.subf %481, %438 : vector<16x16xf32>
    %483 = arith.mulf %426, %482 : vector<16x16xf32>
    %cst_151 = arith.constant 0.000000e+00 : f32
    %cst_152 = arith.constant 1.000000e+00 : f32
    %484 = vector.broadcast %cst_151 : f32 to vector<16x16xf32>
    %485 = arith.maximumf %484, %483 : vector<16x16xf32>
    %486 = vector.broadcast %cst_152 : f32 to vector<16x16xf32>
    %487 = arith.minimumf %486, %485 : vector<16x16xf32>
    %488 = arith.mulf %438, %480 : vector<16x16xf32>
    %cst_153 = arith.constant 1.000000e+00 : f32
    %489 = vector.broadcast %cst_153 : f32 to vector<16x16xf32>
    %490 = arith.subf %489, %488 : vector<16x16xf32>
    %491 = arith.mulf %426, %490 : vector<16x16xf32>
    %cst_154 = arith.constant 0.000000e+00 : f32
    %cst_155 = arith.constant 1.000000e+00 : f32
    %492 = vector.broadcast %cst_154 : f32 to vector<16x16xf32>
    %493 = arith.maximumf %492, %491 : vector<16x16xf32>
    %494 = vector.broadcast %cst_155 : f32 to vector<16x16xf32>
    %495 = arith.minimumf %494, %493 : vector<16x16xf32>
    %cst_156 = arith.constant 1.000000e+00 : f32
    %496 = vector.broadcast %cst_156 : f32 to vector<16x16xf32>
    %497 = arith.subf %496, %480 : vector<16x16xf32>
    %498 = arith.mulf %438, %497 : vector<16x16xf32>
    %cst_157 = arith.constant 1.000000e+00 : f32
    %499 = vector.broadcast %cst_157 : f32 to vector<16x16xf32>
    %500 = arith.subf %499, %498 : vector<16x16xf32>
    %501 = arith.mulf %426, %500 : vector<16x16xf32>
    %cst_158 = arith.constant 0.000000e+00 : f32
    %cst_159 = arith.constant 1.000000e+00 : f32
    %502 = vector.broadcast %cst_158 : f32 to vector<16x16xf32>
    %503 = arith.maximumf %502, %501 : vector<16x16xf32>
    %504 = vector.broadcast %cst_159 : f32 to vector<16x16xf32>
    %505 = arith.minimumf %504, %503 : vector<16x16xf32>
    %cst_160 = arith.constant 0.000000e+00 : f32
    %506 = vector.broadcast %cst_160 : f32 to vector<16x16xf32>
    %507 = arith.cmpf oeq, %479, %506 : vector<16x16xf32>
    %cst_161 = arith.constant 1.000000e+00 : f32
    %508 = vector.broadcast %cst_161 : f32 to vector<16x16xf32>
    %509 = arith.cmpf oeq, %479, %508 : vector<16x16xf32>
    %cst_162 = arith.constant 2.000000e+00 : f32
    %510 = vector.broadcast %cst_162 : f32 to vector<16x16xf32>
    %511 = arith.cmpf oeq, %479, %510 : vector<16x16xf32>
    %cst_163 = arith.constant 3.000000e+00 : f32
    %512 = vector.broadcast %cst_163 : f32 to vector<16x16xf32>
    %513 = arith.cmpf oeq, %479, %512 : vector<16x16xf32>
    %cst_164 = arith.constant 4.000000e+00 : f32
    %514 = vector.broadcast %cst_164 : f32 to vector<16x16xf32>
    %515 = arith.cmpf oeq, %479, %514 : vector<16x16xf32>
    %516 = arith.select %515, %505, %426 : vector<16x16xi1>, vector<16x16xf32>
    %517 = arith.select %513, %487, %516 : vector<16x16xi1>, vector<16x16xf32>
    %518 = arith.select %511, %487, %517 : vector<16x16xi1>, vector<16x16xf32>
    %519 = arith.select %509, %495, %518 : vector<16x16xi1>, vector<16x16xf32>
    %520 = arith.select %507, %426, %519 : vector<16x16xi1>, vector<16x16xf32>
    %cst_165 = arith.constant 0.000000e+00 : f32
    %521 = vector.broadcast %cst_165 : f32 to vector<16x16xf32>
    %522 = arith.cmpf oeq, %479, %521 : vector<16x16xf32>
    %cst_166 = arith.constant 1.000000e+00 : f32
    %523 = vector.broadcast %cst_166 : f32 to vector<16x16xf32>
    %524 = arith.cmpf oeq, %479, %523 : vector<16x16xf32>
    %cst_167 = arith.constant 2.000000e+00 : f32
    %525 = vector.broadcast %cst_167 : f32 to vector<16x16xf32>
    %526 = arith.cmpf oeq, %479, %525 : vector<16x16xf32>
    %cst_168 = arith.constant 3.000000e+00 : f32
    %527 = vector.broadcast %cst_168 : f32 to vector<16x16xf32>
    %528 = arith.cmpf oeq, %479, %527 : vector<16x16xf32>
    %cst_169 = arith.constant 4.000000e+00 : f32
    %529 = vector.broadcast %cst_169 : f32 to vector<16x16xf32>
    %530 = arith.cmpf oeq, %479, %529 : vector<16x16xf32>
    %531 = arith.select %530, %487, %487 : vector<16x16xi1>, vector<16x16xf32>
    %532 = arith.select %528, %495, %531 : vector<16x16xi1>, vector<16x16xf32>
    %533 = arith.select %526, %426, %532 : vector<16x16xi1>, vector<16x16xf32>
    %534 = arith.select %524, %426, %533 : vector<16x16xi1>, vector<16x16xf32>
    %535 = arith.select %522, %505, %534 : vector<16x16xi1>, vector<16x16xf32>
    %cst_170 = arith.constant 0.000000e+00 : f32
    %536 = vector.broadcast %cst_170 : f32 to vector<16x16xf32>
    %537 = arith.cmpf oeq, %479, %536 : vector<16x16xf32>
    %cst_171 = arith.constant 1.000000e+00 : f32
    %538 = vector.broadcast %cst_171 : f32 to vector<16x16xf32>
    %539 = arith.cmpf oeq, %479, %538 : vector<16x16xf32>
    %cst_172 = arith.constant 2.000000e+00 : f32
    %540 = vector.broadcast %cst_172 : f32 to vector<16x16xf32>
    %541 = arith.cmpf oeq, %479, %540 : vector<16x16xf32>
    %cst_173 = arith.constant 3.000000e+00 : f32
    %542 = vector.broadcast %cst_173 : f32 to vector<16x16xf32>
    %543 = arith.cmpf oeq, %479, %542 : vector<16x16xf32>
    %cst_174 = arith.constant 4.000000e+00 : f32
    %544 = vector.broadcast %cst_174 : f32 to vector<16x16xf32>
    %545 = arith.cmpf oeq, %479, %544 : vector<16x16xf32>
    %546 = arith.select %545, %426, %495 : vector<16x16xi1>, vector<16x16xf32>
    %547 = arith.select %543, %426, %546 : vector<16x16xi1>, vector<16x16xf32>
    %548 = arith.select %541, %505, %547 : vector<16x16xi1>, vector<16x16xf32>
    %549 = arith.select %539, %487, %548 : vector<16x16xi1>, vector<16x16xf32>
    %550 = arith.select %537, %487, %549 : vector<16x16xi1>, vector<16x16xf32>
    %cst_175 = arith.constant 2.989000e-01 : f32
    %551 = vector.broadcast %cst_175 : f32 to vector<16x16xf32>
    %552 = arith.mulf %551, %520 : vector<16x16xf32>
    %cst_176 = arith.constant 5.870000e-01 : f32
    %553 = vector.broadcast %cst_176 : f32 to vector<16x16xf32>
    %554 = arith.mulf %553, %535 : vector<16x16xf32>
    %555 = arith.addf %552, %554 : vector<16x16xf32>
    %cst_177 = arith.constant 1.140000e-01 : f32
    %556 = vector.broadcast %cst_177 : f32 to vector<16x16xf32>
    %557 = arith.mulf %556, %550 : vector<16x16xf32>
    %558 = arith.addf %555, %557 : vector<16x16xf32>
    %559 = vector.broadcast %304 : f32 to vector<16x16xf32>
    %560 = arith.mulf %559, %558 : vector<16x16xf32>
    %cst_178 = arith.constant 1.000000e+00 : f32
    %561 = arith.subf %cst_178, %304 : f32
    %562 = vector.broadcast %561 : f32 to vector<16x16xf32>
    %563 = arith.mulf %562, %520 : vector<16x16xf32>
    %564 = arith.addf %560, %563 : vector<16x16xf32>
    %565 = vector.broadcast %304 : f32 to vector<16x16xf32>
    %566 = arith.mulf %565, %558 : vector<16x16xf32>
    %cst_179 = arith.constant 1.000000e+00 : f32
    %567 = arith.subf %cst_179, %304 : f32
    %568 = vector.broadcast %567 : f32 to vector<16x16xf32>
    %569 = arith.mulf %568, %535 : vector<16x16xf32>
    %570 = arith.addf %566, %569 : vector<16x16xf32>
    %571 = vector.broadcast %304 : f32 to vector<16x16xf32>
    %572 = arith.mulf %571, %558 : vector<16x16xf32>
    %cst_180 = arith.constant 1.000000e+00 : f32
    %573 = arith.subf %cst_180, %304 : f32
    %574 = vector.broadcast %573 : f32 to vector<16x16xf32>
    %575 = arith.mulf %574, %550 : vector<16x16xf32>
    %576 = arith.addf %572, %575 : vector<16x16xf32>
    %577 = tpu.concatenate %564, %570, %576 in 1 : vector<16x16xf32>, vector<16x16xf32>, vector<16x16xf32> -> vector<16x48xf32>
    %578 = arith.truncf %577 : vector<16x48xf32> to vector<16x48xbf16>
    %cst_181 = arith.constant dense<0.000000e+00> : vector<16x48xf32>
    %579 = tpu.matmul %316, %578, %cst_181 {dimension_numbers = #tpu.dot_dimension_numbers<[1], [0], [0], [1], [0, 0, 1, 1], [], []>} : vector<16x16xbf16>, vector<16x48xbf16>, vector<16x48xf32> -> vector<16x48xf32>
    %580 = arith.truncf %579 : vector<16x48xf32> to vector<16x48xbf16>
    %cst_182 = arith.constant dense<0.000000e+00> : vector<16x48xf32>
    %581 = tpu.matmul %580, %319, %cst_182 {dimension_numbers = #tpu.dot_dimension_numbers<[1], [0], [0], [1], [0, 0, 1, 1], [], []>} : vector<16x48xbf16>, vector<48x48xbf16>, vector<16x48xf32> -> vector<16x48xf32>
    %582 = arith.index_cast %c1_i32 : i32 to index
    %c0_183 = arith.constant 0 : index
    %c0_184 = arith.constant 0 : index
    %583 = vector.load %arg7[%582, %c0_183, %c0_184] : memref<2x16x48xf32, #tpu.memory_space<vmem>>, vector<1x16x48xf32>
    %584 = vector.shape_cast %583 : vector<1x16x48xf32> to vector<16x48xf32>
    %585 = vector.shape_cast %581 : vector<16x48xf32> to vector<1x16x48xf32>
    tpu.vector_store %arg7[%582, %c0_183, %c0_184], %585 {strides = array<i32>} : memref<2x16x48xf32, #tpu.memory_space<vmem>>, vector<1x16x48xf32>,
    %c2_i32_185 = arith.constant 2 : i32
    return
  }
  func.func @transform_0(%arg0: i32) -> (i32, i32) {
    %c0_i32 = arith.constant 0 : i32
    %c0_i32_0 = arith.constant 0 : i32
    %c0_i32_1 = arith.constant 0 : i32
    return %c0_i32, %c0_i32_0 : i32, i32
  }
  func.func @transform_1(%arg0: i32) -> (i32, i32, i32) {
    %c0_i32 = arith.constant 0 : i32
    %c0_i32_0 = arith.constant 0 : i32
    %c0_i32_1 = arith.constant 0 : i32
    return %arg0, %c0_i32, %c0_i32_0 : i32, i32, i32
  }
  func.func @transform_2(%arg0: i32) -> (i32, i32, i32) {
    %c0_i32 = arith.constant 0 : i32
    %c0_i32_0 = arith.constant 0 : i32
    %c0_i32_1 = arith.constant 0 : i32
    return %arg0, %c0_i32, %c0_i32_0 : i32, i32, i32
  }
  func.func @transform_3(%arg0: i32) -> (i32, i32, i32) {
    %c0_i32 = arith.constant 0 : i32
    %c0_i32_0 = arith.constant 0 : i32
    %c0_i32_1 = arith.constant 0 : i32
    return %arg0, %c0_i32, %c0_i32_0 : i32, i32, i32
  }
  func.func @transform_4(%arg0: i32) -> (i32, i32, i32) {
    %c0_i32 = arith.constant 0 : i32
    %c0_i32_0 = arith.constant 0 : i32
    %c0_i32_1 = arith.constant 0 : i32
    return %arg0, %c0_i32, %c0_i32_0 : i32, i32, i32
  }
  func.func @transform_5(%arg0: i32) -> (i32, i32, i32) {
    %c0_i32 = arith.constant 0 : i32
    %c0_i32_0 = arith.constant 0 : i32
    %c0_i32_1 = arith.constant 0 : i32
    return %arg0, %c0_i32, %c0_i32_0 : i32, i32, i32
  }
  func.func @transform_6(%arg0: i32) -> (i32, i32, i32) {
    %c0_i32 = arith.constant 0 : i32
    %c0_i32_0 = arith.constant 0 : i32
    %c0_i32_1 = arith.constant 0 : i32
    return %arg0, %c0_i32, %c0_i32_0 : i32, i32, i32
  }
}

</mosaic_0001>

<bundles_post_ra>
// kernel: tpu_custom_call.1
= control target key start
LH: loop header
LB: loop body
LE: loop exit
PB: predicated region body
PF: predicated region fallthrough
CT: control target
= control target key end

     0   :  { %11 = vsyncpa [#allocation5], 0  ;;  %s2324_s0 = inlined_call_operand.hbm [shape: f32[2,8], index: 0, kind: input, shape index: {}]   ;;  %s2325_s1 = inlined_call_operand.hbm [shape: bf16[2,16,48], index: 1, kind: input, shape index: {}]   ;;  %s2326_s2 = inlined_call_operand.hbm [shape: bf16[2,16,16], index: 2, kind: input, shape index: {}]   ;;  %s2327_s3 = inlined_call_operand.hbm [shape: bf16[2,48,48], index: 3, kind: input, shape index: {}]   ;;  %s2328_s4 = inlined_call_operand.hbm [shape: bf16[2,16,16], index: 4, kind: input, shape index: {}]   ;;  %s2329_s5 = inlined_call_operand.hbm [shape: bf16[2,48,48], index: 5, kind: input, shape index: {}]   ;;  %s2330_s6 = inlined_call_operand.hbm [shape: f32[2,16,48], index: 6, kind: output, shape index: {}]  }
   0x1   :  { %12 = vsyncpa [#allocation3], 0 }
   0x2   :  { %13 = vsyncpa [#allocation8], 0 }
   0x3   :  { %14 = vsyncpa [#allocation11], 0 }
   0x4   :  { %15 = vsyncpa [#allocation4], 0  ;;  %s1702_s21 = smov [#allocation7]   ;;  %s1703_s23 = smov [#allocation10]  }
   0x5   :  { %s41_s22 = sshll.u32 %s1702_s21, 4  ;;  %s65_s24 = sshll.u32 %s1703_s23, 4  ;;  %s42_s22 = int_to_ptr.vmem [resolvable:$true] %s41_s22  ;;  %s1754_s24 = int_to_ptr.vmem [resolvable:$true] %s65_s24 }
   0x6   :  { %s1550_s27 = scalar_lea.hbm %s2326_s2, 256 }
   0x7   :  { %p1551_p0 = scmp.ne.s32.totalorder %s2326_s2, %s1550_s27  ;;  %p1554_p1 = scmp.lt.u32.totalorder %s1550_s27, %s2326_s2 }
   0x9   :  { %p1556_p2 = pnand %p1554_p1, %p1551_p0 }
   0xb   :  { %1559 = shalt.err (!%p1556_p2)
}
   0xc   :  { %s1560_s8 = scalar_lea.vmem %s42_s22, 256  ;;  %p1565_p4 = scmp.lt.s32.totalorder %s42_s22, %s42_s22 }
   0xd   :  { %p1561_p3 = scmp.ne.s32.totalorder %s42_s22, %s1560_s8  ;;  %p1566_p5 = scmp.lt.s32.totalorder %s1560_s8, %s1560_s8 }
   0xf   :  { %p1567_p6 = por %p1566_p5, %p1565_p4 }
  0x11   :  { %p1568_p7 = pnand %p1567_p6, %p1561_p3 }
  0x13   :  { %1571 = shalt.err (!%p1568_p7)
}
  0x14   :  { %s1704_s9 = smov 64   ;;  %s1705_s10 = smov 4  }
  0x15   :  { %47 = dma.hbm_to_vmem [thread:$0]  %s2326_s2, 256, %s42_s22, [#allocation8], %s1704_s9, %s1704_s9, %s1705_s10  }
  0x16   :  { %s1572_s15 = scalar_lea.hbm %s2328_s4, 256 }
  0x17   :  { %p1573_p8 = scmp.ne.s32.totalorder %s2328_s4, %s1572_s15  ;;  %p1576_p9 = scmp.lt.u32.totalorder %s1572_s15, %s2328_s4 }
  0x19   :  { %p1578_p10 = pnand %p1576_p9, %p1573_p8 }
  0x1b   :  { %1581 = shalt.err (!%p1578_p10)
}
  0x1c   :  { %s1582_s20 = scalar_lea.vmem %s1754_s24, 256  ;;  %p1587_p12 = scmp.lt.s32.totalorder %s1754_s24, %s1754_s24 }
  0x1d   :  { %p1583_p11 = scmp.ne.s32.totalorder %s1754_s24, %s1582_s20  ;;  %p1588_p13 = scmp.lt.s32.totalorder %s1582_s20, %s1582_s20 }
  0x1f   :  { %p1589_p0 = por %p1588_p13, %p1587_p12 }
  0x21   :  { %p1590_p1 = pnand %p1589_p0, %p1583_p11 }
  0x23   :  { %1593 = shalt.err (!%p1590_p1)
}
  0x24   :  { %71 = dma.hbm_to_vmem [thread:$0]  %s2328_s4, 256, %s1754_s24, [#allocation11], %s1704_s9, %s1704_s9, %s1705_s10  }
  0x25   :  { %s1594_s25 = scalar_lea.hbm %s2324_s0, 32 }
  0x26   :  { %p1595_p2 = scmp.ne.s32.totalorder %s2324_s0, %s1594_s25  ;;  %p1598_p3 = scmp.lt.u32.totalorder %s1594_s25, %s2324_s0 }
  0x28   :  { %p1600_p4 = pnand %p1598_p3, %p1595_p2 }
  0x2a   :  { %1603 = shalt.err (!%p1600_p4)
}
  0x2b   :  { %s1706_s30 = smov [#allocation2]   ;;  %s1707_s4 = smov [#allocation6]  }
  0x2c   :  { %23 = dma.hbm_to_smem %s2324_s0, 32, %s1706_s30, [#allocation5]  }
  0x2d   :  { %s29_s24 = sshll.u32 %s1707_s4, 4  ;;  %s1708_s11 = smov [#allocation9]   ;;  %s30_s24 = int_to_ptr.vmem [resolvable:$true] %s29_s24 }
  0x2e   :  { %s53_s12 = sshll.u32 %s1708_s11, 4  ;;  %s1604_s15 = scalar_lea.hbm %s2325_s1, 256  ;;  %s54_s12 = int_to_ptr.vmem [resolvable:$true] %s53_s12 }
  0x2f   :  { %p1605_p5 = scmp.ne.s32.totalorder %s2325_s1, %s1604_s15  ;;  %p1608_p6 = scmp.lt.u32.totalorder %s1604_s15, %s2325_s1 }
  0x31   :  { %p1610_p7 = pnand %p1608_p6, %p1605_p5 }
  0x33   :  { %1613 = shalt.err (!%p1610_p7)
}
  0x34   :  { %s1614_s0 = scalar_lea.vmem %s30_s24, 256  ;;  %p1619_p9 = scmp.lt.s32.totalorder %s30_s24, %s30_s24 }
  0x35   :  { %p1615_p8 = scmp.ne.s32.totalorder %s30_s24, %s1614_s0  ;;  %p1620_p10 = scmp.lt.s32.totalorder %s1614_s0, %s1614_s0 }
  0x37   :  { %p1621_p11 = por %p1620_p10, %p1619_p9 }
  0x39   :  { %p1622_p12 = pnand %p1621_p11, %p1615_p8 }
  0x3b   :  { %1625 = shalt.err (!%p1622_p12)
}
  0x3c   :  { %35 = dma.hbm_to_vmem [thread:$0]  %s2325_s1, 256, %s30_s24, [#allocation3], %s1704_s9, %s1704_s9, %s1705_s10  }
  0x3d   :  { %s1626_s23 = scalar_lea.hbm %s2327_s3, 768 }
  0x3e   :  { %p1627_p13 = scmp.ne.s32.totalorder %s2327_s3, %s1626_s23  ;;  %p1630_p0 = scmp.lt.u32.totalorder %s1626_s23, %s2327_s3 }
  0x40   :  { %p1632_p1 = pnand %p1630_p0, %p1627_p13 }
  0x42   :  { %1635 = shalt.err (!%p1632_p1)
}
  0x43   :  { %s1636_s29 = scalar_lea.vmem %s54_s12, 768  ;;  %p1641_p3 = scmp.lt.s32.totalorder %s54_s12, %s54_s12 }
  0x44   :  { %p1637_p2 = scmp.ne.s32.totalorder %s54_s12, %s1636_s29  ;;  %p1642_p4 = scmp.lt.s32.totalorder %s1636_s29, %s1636_s29 }
  0x46   :  { %p1643_p5 = por %p1642_p4, %p1641_p3 }
  0x48   :  { %p1644_p6 = pnand %p1643_p5, %p1637_p2 }
  0x4a   :  { %1647 = shalt.err (!%p1644_p6)
}
  0x4b   :  { %59 = dma.hbm_to_vmem [thread:$0]  %s2327_s3, 768, %s54_s12, [#allocation8], %s1704_s9, %s1704_s9, %s1705_s10  }
  0x4c   :  { %s1709_s7 = smov [#allocation12]   ;;  %s1648_s11 = scalar_lea.hbm %s2329_s5, 768 }
  0x4d   :  { %s77_s8 = sshll.u32 %s1709_s7, 4  ;;  %p1649_p7 = scmp.ne.s32.totalorder %s2329_s5, %s1648_s11  ;;  %s78_s8 = int_to_ptr.vmem [resolvable:$true] %s77_s8 }
  0x4e   :  { %p1652_p8 = scmp.lt.u32.totalorder %s1648_s11, %s2329_s5 }
  0x50   :  { %p1654_p9 = pnand %p1652_p8, %p1649_p7 }
  0x52   :  { %1657 = shalt.err (!%p1654_p9)
}
  0x53   :  { %s1658_s17 = scalar_lea.vmem %s78_s8, 768  ;;  %p1663_p11 = scmp.lt.s32.totalorder %s78_s8, %s78_s8 }
  0x54   :  { %p1659_p10 = scmp.ne.s32.totalorder %s78_s8, %s1658_s17  ;;  %p1664_p12 = scmp.lt.s32.totalorder %s1658_s17, %s1658_s17 }
  0x56   :  { %p1665_p13 = por %p1664_p12, %p1663_p11 }
  0x58   :  { %p1666_p0 = pnand %p1665_p13, %p1659_p10 }
  0x5a   :  { %1669 = shalt.err (!%p1666_p0)
}
  0x5b   :  { %83 = dma.hbm_to_vmem [thread:$0]  %s2329_s5, 768, %s78_s8, [#allocation11], %s1704_s9, %s1704_s9, %s1705_s10  }
  0x5c   :  { %1692 = dma.done.wait [#allocation5], 32  }
  0x5d   :  { %1693 = vsyncadd [#allocation5], 4294967264 }
  0x5e   :  { %1694 = dma.done.wait [#allocation3], 256  }
  0x5f   :  { %1695 = vsyncadd [#allocation3], 4294967040 }
  0x60   :  { %1696 = dma.done.wait [#allocation8], 1024  }
  0x61   :  { %1697 = vsyncadd [#allocation8], 4294966272 }
  0x62   :  { %1698 = dma.done.wait [#allocation11], 1024  }
  0x63   :  { %1699 = vsyncadd [#allocation11], 4294966272 }
  0x64   :  { %102 = sfence }
  0x65   :  { %v1516_v0 = vld [vmem:[#allocation6] sm:$0xff]   ;;  %v1710_v1 = vmov 0.0   ;;  %v1517_v2 = vld [vmem:[#allocation7] sm:$0xff]   ;;  %vm1711_vm0 = vmmov 0   ;;  %vm144_vm1 = vcmask 130048   ;;  %v1519_v4 = vld [vmem:[#allocation9 + $0x8] sm:$0xff]  }
  0x66   :  { %1411 = vmatprep.subr.bf16.mxu1 %v1710_v1  ;;  %1427 = vmatprep.subr.bf16.mxu0 %v1710_v1  ;;  %v1518_v3 = vld [vmem:[#allocation9] sm:$0xff]   ;;  %v1520_v5 = vld [vmem:[#allocation9 + $0x10] sm:$0xff]   ;;  %vm208_vm2 = vcmask 392192   ;;  %v1521_v9 = vld [vmem:[#allocation6 + $0x8] sm:$0xff]   ;;  %s106_s5 = sld [smem:[#allocation2]]  ;;  %s1712_s9 = smov 96  }
  0x67   :  { %1412 = vmatpush3.bf16.msra.mxu1 %v1516_v0  ;;  %1413 = vmatprep.mubr.msk.bf16.mxu1 %vm1711_vm0, %v1710_v1  ;;  %v1522_v12 = vld [vmem:[#allocation7 + $0x8] sm:$0xff]   ;;  %v1524_v14 = vld [vmem:[#allocation9 + $0x20] sm:$0xff]   ;;  %v1525_v15 = vld [vmem:[#allocation9 + $0x28] sm:$0xff]   ;;  %s1713_s10 = smov 112   ;;  %s1369_s18 = sld [smem:[#allocation2 + $0x80]] }
  0x68   :  { %1417 = vmatprep.subr.bf16.mxu1 %v1710_v1  ;;  %1429 = vmatprep.mubr.msk.bf16.mxu0 %vm1711_vm0, %v1710_v1  ;;  %v1523_v13 = vld [vmem:[#allocation9 + $0x18] sm:$0xff]   ;;  %s1352_s19 = sld [smem:[#allocation2 + $0x1]]  ;;  %s1893_s22 = sld [smem:[#allocation2 + $0x2]] }
  0x69   :  { %s1714_s25 = smov 16   ;;  %s1715_s26 = smov 32  }
  0x6a   :  { %1414 = vmatmul.mubr.msk.bf16.vlgmr.msra.gmra.mrb[0].mxu1 %vm144_vm1, %v1517_v2  ;;  %s1370_s27 = sld [smem:[#allocation2 + $0x81]]  ;;  %s1994_s7 = sld [smem:[#allocation2 + $0x3]] }
  0x6b   :  { %1418 = vmatpush3.bf16.msra.mxu1 %v1518_v3  ;;  %1423 = vmatprep.mubr.msk.bf16.mxu1 %vm1711_vm0, %v1710_v1  ;;  %s2027_s8 = sld [smem:[#allocation2 + $0x4]]  ;;  %s2099_s24 = sld [smem:[#allocation2 + $0x82]] }
  0x6c   :  { %1419 = vmatprep.subr.bf16.mxu1 %v1710_v1  ;;  %v253_v16 = vstv %s106_s5  ;;  %s2182_s13 = sld [smem:[#allocation2 + $0x83]]  ;;  %s2214_s14 = sld [smem:[#allocation2 + $0x84]] }
  0x6d   :  { %v869_v49 = vstv %s1369_s18  ;;  %s1716_s16 = smov [#allocation13]  }
  0x6e   :  { %s304_s0 = ssub.f32 1.0, %s1352_s19  ;;  %v301_v3 = vstv %s1352_s19  ;;  %s1337_s17 = sshll.u32 %s1716_s16, 4  ;;  %s1338_s17 = int_to_ptr.vmem [resolvable:$true] %s1337_s17 }
  0x6f   :  { %1420 = vmatpush3.bf16.msra.mxu1 %v1519_v4  ;;  %s342_s23 = ssub.f32 1.0, %s1893_s22  ;;  %s1670_s3 = scalar_lea.vmem %s1338_s17, 512 }
  0x70   :  { %1421 = vmatprep.subr.bf16.mxu1 %v1710_v1  ;;  %s920_s28 = ssub.f32 1.0, %s1370_s27  ;;  %p1671_p1 = scmp.ne.s32.totalorder %s1338_s17, %s1670_s3 }
  0x71   :  { %s567_s4 = ssub.f32 1.0, %s2027_s8  ;;  %p1675_p2 = scmp.lt.s32.totalorder %s1338_s17, %s1338_s17 }
  0x72   :  { %s958_s11 = ssub.f32 1.0, %s2099_s24  ;;  %p1676_p3 = scmp.lt.s32.totalorder %s1670_s3, %s1670_s3 }
  0x73   :  { %1422 = vmatpush3.bf16.msra.mxu1 %v1520_v5  ;;  %s1182_s15 = ssub.f32 1.0, %s2214_s14 }
  0x74   :  { %1443 = vmatprep.subr.bf16.mxu1 %v1710_v1  ;;  %p1677_p4 = por %p1676_p3, %p1675_p2 }
  0x76   :  { %p1678_p5 = pnand %p1677_p4, %p1671_p1 }
 0x13d   :  { %v182_v6 = vpop.f32.mrb[0].mxu1 }
 0x13e   :  { %v1415_v7 = vpop.f32.mrb[1].mxu1 }
 0x13f   :  { %v185_v8 = vpop.f32.mrb[2].mxu1 }
 0x140   :  { %v189_v10 = vpack.c.bf16 %v185_v8, %v182_v6  ;;  %v1416_v11 = vpop.f32.mrb[3].mxu1 }
 0x142   :  { %1424 = vmatmul.mubr.msk.bf16.vlgmr.msra.gmra.mrb[4].mxu1 %vm208_vm2, %v189_v10 }
 0x143   :  { %1444 = vmatpush3.bf16.msra.mxu1 %v1521_v9  ;;  %1445 = vmatprep.mubr.msk.bf16.mxu1 %vm1711_vm0, %v1710_v1 }
 0x144   :  { %1449 = vmatprep.subr.bf16.mxu1 %v1710_v1 }
 0x14a   :  { %1446 = vmatmul.mubr.msk.bf16.vlgmr.msra.gmra.mrb[8].mxu1 %vm144_vm1, %v1522_v12 }
 0x14b   :  { %1455 = vmatprep.mubr.msk.bf16.mxu1 %vm1711_vm0, %v1710_v1  ;;  %1450 = vmatpush3.bf16.msra.mxu1 %v1523_v13 }
 0x14c   :  { %1451 = vmatprep.subr.bf16.mxu1 %v1710_v1 }
 0x14f   :  { %1452 = vmatpush3.bf16.msra.mxu1 %v1524_v14 }
 0x150   :  { %1453 = vmatprep.subr.bf16.mxu1 %v1710_v1 }
 0x153   :  { %1454 = vmatpush3.bf16.msra.mxu1 %v1525_v15 }
 0x215   :  { %v246_v17 = vpop.f32.mrb[4].mxu1 }
 0x216   :  { %v254_v18 = vmul.f32 %v253_v16, %v246_v17  ;;  %v1425_v19 = vpop.f32.mrb[5].mxu1 }
 0x217   :  { %v249_v20 = vpop.f32.mrb[6].mxu1 }
 0x218   :  { %v256_v21 = vmax.f32 %v254_v18, 0.0  ;;  %v255_v22 = vmul.f32 %v253_v16, %v249_v20  ;;  %v1426_v23 = vpop.f32.mrb[7].mxu1 }
 0x21a   :  { %v258_v24 = vmin.f32 %v256_v21, 1.0  ;;  %v257_v25 = vmax.f32 %v255_v22, 0.0 }
 0x21c   :  { %v259_v26 = vmin.f32 %v257_v25, 1.0  ;;  %v274_v27 = vmul.f32 0.114, %v258_v24  ;;  %v262_v28 = vmul.f32 0.587, %v258_v24  ;;  %v302_v4 = vmul.f32 %v301_v3, %v258_v24 }
 0x21d   :  { %v799_v29 = vpop.f32.mrb[8].mxu1  ;;  %v260_v37 = vmul.f32 0.2989, %v258_v24 }
 0x21e   :  { %v1447_v30 = vpop.f32.mrb[9].mxu1  ;;  %278 = vrot.lane.b32.xlu1 %v274_v27, %s1712_s9  ;;  %266 = vrot.lane.b32.xlu0 %v262_v28, %s1713_s10  ;;  %v275_v33 = vmul.f32 0.114, %v259_v26  ;;  %v263_v35 = vmul.f32 0.587, %v259_v26  ;;  %v303_v5 = vmul.f32 %v301_v3, %v259_v26  ;;  %v343_v27 = vstv %s342_s23 }
 0x21f   :  { %v802_v31 = vpop.f32.mrb[10].mxu1  ;;  %v261_v40 = vmul.f32 0.2989, %v259_v26 }
 0x220   :  { %v806_v32 = vpack.c.bf16 %v802_v31, %v799_v29  ;;  %v1448_v34 = vpop.f32.mrb[11].mxu1 }
 0x222   :  { %1456 = vmatmul.mubr.msk.bf16.vlgmr.msra.gmra.mrb[12].mxu1 %vm208_vm2, %v806_v32  ;;  %280 = vrot.lane.b32.xlu1 %v275_v33, %s1712_s9 }
 0x223   :  { %268 = vrot.lane.b32.xlu0 %v263_v35, %s1713_s10 }
 0x290   :  { %v267_v36 = vpop.permute.xlu0 %266  ;;  %v279_v38 = vpop.permute.xlu1 %278 }
 0x291   :  { %v272_v39 = vadd.f32 %v267_v36, %v260_v37 }
 0x293   :  { %v284_v42 = vadd.f32 %v279_v38, %v272_v39 }
 0x294   :  { %v281_v44 = vpop.permute.xlu1 %280 }
 0x295   :  { %v269_v41 = vpop.permute.xlu0 %268  ;;  %v286_v46 = vsel %vm144_vm1, %v284_v42, 0.0 }
 0x296   :  { %v273_v43 = vadd.f32 %v269_v41, %v261_v40 }
 0x298   :  { %v285_v45 = vadd.f32 %v281_v44, %v273_v43 }
 0x29a   :  { %v287_v47 = vsel %vm144_vm1, %v285_v45, 0.0 }
 0x29b   :  { %v288_v48 = vadd.f32 %v287_v47, %v286_v46 }
 0x29d   :  { %289 = vadd.xlane.f32.xlu0 %v288_v48  ;;  %v339_v48 = vstv %s1893_s22 }
 0x2f5   :  { %v862_v50 = vpop.f32.mrb[12].mxu1 }
 0x2f6   :  { %v870_v51 = vmul.f32 %v869_v49, %v862_v50  ;;  %v1457_v52 = vpop.f32.mrb[13].mxu1 }
 0x2f7   :  { %v865_v53 = vpop.f32.mrb[14].mxu1 }
 0x2f8   :  { %v872_v54 = vmax.f32 %v870_v51, 0.0  ;;  %v871_v55 = vmul.f32 %v869_v49, %v865_v53  ;;  %v1458_v56 = vpop.f32.mrb[15].mxu1 }
 0x2fa   :  { %v1877_v57 = vmin.f32 %v872_v54, 1.0  ;;  %v873_v15 = vmax.f32 %v871_v55, 0.0 }
 0x2fc   :  { %v878_v58 = vmul.f32 0.587, %v1877_v57  ;;  %v1884_v17 = vmin.f32 %v873_v15, 1.0  ;;  %v890_v20 = vmul.f32 0.114, %v1877_v57 }
 0x2fd   :  { %v876_v37 = vmul.f32 0.2989, %v1877_v57 }
 0x2fe   :  { %882 = vrot.lane.b32.xlu1 %v878_v58, %s1713_s10  ;;  %v879_v19 = vmul.f32 0.587, %v1884_v17  ;;  %v891_v21 = vmul.f32 0.114, %v1884_v17  ;;  %v877_v40 = vmul.f32 0.2989, %v1884_v17 }
 0x32a   :  { %v290_v59 = vpop.xlane.xlu0 %289 }
 0x32b   :  { %v291_v60 = vrot.slane %v290_v59, 4 }
 0x32d   :  { %v292_v61 = vadd.f32 %v291_v60, %v290_v59 }
 0x32f   :  { %v293_v62 = vrot.slane %v292_v61, 2 }
 0x331   :  { %v294_v63 = vadd.f32 %v293_v62, %v292_v61 }
 0x333   :  { %v295_v0 = vrot.slane %v294_v63, 1 }
 0x335   :  { %v296_v2 = vadd.f32 %v295_v0, %v294_v63 }
 0x337   :  { %1475 = vpush %v296_v2 }
 0x368   :  { %s1476_s20 = spop %1475 }
 0x369   :  { %s300_s2 = smul.f32 0.00390625, %s1476_s20 }
 0x36b   :  { %s305_s21 = smul.f32 %s304_s0, %s300_s2 }
 0x36d   :  { %v306_v6 = vstv %s305_s21 }
 0x36e   :  { %v307_v7 = vadd.f32 %v306_v6, %v302_v4  ;;  %v308_v8 = vadd.f32 %v306_v6, %v303_v5 }
 0x370   :  { %v309_v9 = vmax.f32 %v307_v7, 0.0  ;;  %v310_v10 = vmax.f32 %v308_v8, 0.0  ;;  %v883_v22 = vpop.permute.xlu1 %882 }
 0x371   :  { %v888_v39 = vadd.f32 %v883_v22, %v876_v37 }
 0x372   :  { %v311_v11 = vmin.f32 %v309_v9, 1.0  ;;  %v312_v12 = vmin.f32 %v310_v10, 1.0 }
 0x374   :  { %v315_v13 = vmul.f32 0.587, %v311_v11  ;;  %v316_v14 = vmul.f32 0.587, %v312_v12  ;;  %v327_v16 = vmul.f32 0.114, %v311_v11  ;;  %v340_v49 = vmul.f32 %v339_v48, %v311_v11 }
 0x375   :  { %v328_v18 = vmul.f32 0.114, %v312_v12  ;;  %v313_v25 = vmul.f32 0.2989, %v311_v11  ;;  %v314_v29 = vmul.f32 0.2989, %v312_v12  ;;  %v341_v53 = vmul.f32 %v339_v48, %v312_v12 }
 0x376   :  { %319 = vrot.lane.b32.xlu1 %v315_v13, %s1713_s10 }
 0x37a   :  { %321 = vrot.lane.b32.xlu1 %v316_v14, %s1713_s10 }
 0x37e   :  { %331 = vrot.lane.b32.xlu1 %v327_v16, %s1712_s9 }
 0x382   :  { %333 = vrot.lane.b32.xlu1 %v328_v18, %s1712_s9 }
 0x386   :  { %884 = vrot.lane.b32.xlu1 %v879_v19, %s1713_s10 }
 0x38a   :  { %894 = vrot.lane.b32.xlu1 %v890_v20, %s1712_s9 }
 0x38e   :  { %896 = vrot.lane.b32.xlu1 %v891_v21, %s1712_s9 }
 0x3e8   :  { %v320_v23 = vpop.permute.xlu1 %319 }
 0x3e9   :  { %v325_v26 = vadd.f32 %v320_v23, %v313_v25 }
 0x3ec   :  { %v322_v24 = vpop.permute.xlu1 %321 }
 0x3ed   :  { %v326_v31 = vadd.f32 %v322_v24, %v314_v29 }
 0x3f0   :  { %v332_v28 = vpop.permute.xlu1 %331 }
 0x3f1   :  { %v337_v30 = vadd.f32 %v332_v28, %v325_v26 }
 0x3f3   :  { %v344_v32 = vmul.f32 %v343_v27, %v337_v30 }
 0x3f4   :  { %v334_v33 = vpop.permute.xlu1 %333 }
 0x3f5   :  { %v338_v34 = vadd.f32 %v334_v33, %v326_v31  ;;  %354 = vrot.lane.b32.xlu0 %v344_v32, %s1714_s25  ;;  %v346_v12 = vadd.f32 %v344_v32, %v340_v49 }
 0x3f7   :  { %v345_v35 = vmul.f32 %v343_v27, %v338_v34  ;;  %v348_v14 = vmax.f32 %v346_v12, 0.0  ;;  %v917_v34 = vstv %s1370_s27 }
 0x3f8   :  { %v885_v36 = vpop.permute.xlu1 %884  ;;  %v919_v37 = vmul.f32 %v917_v34, %v1884_v17 }
 0x3f9   :  { %356 = vrot.lane.b32.xlu1 %v345_v35, %s1714_s25  ;;  %v889_v41 = vadd.f32 %v885_v36, %v877_v40  ;;  %v347_v15 = vadd.f32 %v345_v35, %v341_v53  ;;  %v1913_v18 = vmin.f32 %v348_v14, 1.0  ;;  %v918_v36 = vmul.f32 %v917_v34, %v1877_v57 }
 0x3fb   :  { %v349_v19 = vmax.f32 %v347_v15, 0.0 }
 0x3fc   :  { %v895_v38 = vpop.permute.xlu1 %894 }
 0x3fd   :  { %366 = vrot.lane.b32.xlu1 %v344_v32, %s1715_s26  ;;  %v900_v42 = vadd.f32 %v895_v38, %v888_v39  ;;  %v1921_v25 = vmin.f32 %v349_v19, 1.0 }
 0x3ff   :  { %v902_v45 = vsel %vm144_vm1, %v900_v42, 0.0 }
 0x400   :  { %v897_v43 = vpop.permute.xlu1 %896 }
 0x401   :  { %v901_v44 = vadd.f32 %v897_v43, %v889_v41  ;;  %368 = vrot.lane.b32.xlu1 %v345_v35, %s1715_s26 }
 0x403   :  { %v903_v46 = vsel %vm144_vm1, %v901_v44, 0.0 }
 0x404   :  { %v904_v47 = vadd.f32 %v903_v46, %v902_v45 }
 0x425   :  { %905 = vadd.xlane.f32.xlu1 %v904_v47 }
 0x467   :  { %v355_v50 = vpop.permute.xlu0 %354 }
 0x468   :  { %v360_v51 = vadd.f32 %v355_v50, %v340_v49 }
 0x46a   :  { %v362_v52 = vmax.f32 %v360_v51, 0.0 }
 0x46b   :  { %v357_v54 = vpop.permute.xlu1 %356 }
 0x46c   :  { %v364_v55 = vmin.f32 %v362_v52, 1.0  ;;  %v361_v56 = vadd.f32 %v357_v54, %v341_v53 }
 0x46e   :  { %v363_v58 = vmax.f32 %v361_v56, 0.0  ;;  %380 = vrot.lane.b32.xlu0 %v364_v55, %s1713_s10 }
 0x46f   :  { %v367_v59 = vpop.permute.xlu1 %366 }
 0x470   :  { %v365_v60 = vmin.f32 %v363_v58, 1.0  ;;  %v372_v61 = vadd.f32 %v367_v59, %v340_v49 }
 0x472   :  { %v374_v62 = vmax.f32 %v372_v61, 0.0  ;;  %382 = vrot.lane.b32.xlu0 %v365_v60, %s1713_s10 }
 0x473   :  { %v369_v63 = vpop.permute.xlu1 %368 }
 0x474   :  { %v376_v0 = vmin.f32 %v374_v62, 1.0  ;;  %v373_v2 = vadd.f32 %v369_v63, %v341_v53 }
 0x476   :  { %v375_v3 = vmax.f32 %v373_v2, 0.0  ;;  %390 = vrot.lane.b32.xlu0 %v376_v0, %s1712_s9 }
 0x478   :  { %v377_v4 = vmin.f32 %v375_v3, 1.0 }
 0x47a   :  { %392 = vrot.lane.b32.xlu0 %v377_v4, %s1712_s9 }
 0x4b2   :  { %v906_v5 = vpop.xlane.xlu1 %905 }
 0x4b3   :  { %v907_v6 = vrot.slane %v906_v5, 4 }
 0x4b5   :  { %v908_v7 = vadd.f32 %v907_v6, %v906_v5 }
 0x4b7   :  { %v909_v8 = vrot.slane %v908_v7, 2 }
 0x4b9   :  { %v910_v9 = vadd.f32 %v909_v8, %v908_v7 }
 0x4bb   :  { %v911_v10 = vrot.slane %v910_v9, 1 }
 0x4bd   :  { %v912_v11 = vadd.f32 %v911_v10, %v910_v9 }
 0x4bf   :  { %1477 = vpush %v912_v11 }
 0x4e0   :  { %v1909_v13 = vpop.permute.xlu0 %380 }
 0x4e1   :  { %v386_v20 = vmax.f32 %v1913_v18, %v1909_v13  ;;  %v398_v21 = vmin.f32 %v1913_v18, %v1909_v13 }
 0x4e4   :  { %v1911_v16 = vpop.permute.xlu0 %382 }
 0x4e5   :  { %v387_v27 = vmax.f32 %v1921_v25, %v1911_v16  ;;  %v399_v28 = vmin.f32 %v1921_v25, %v1911_v16 }
 0x4e8   :  { %v391_v22 = vpop.permute.xlu0 %390 }
 0x4e9   :  { %v1919_v23 = vmax.f32 %v386_v20, %v391_v22  ;;  %v400_v24 = vmin.f32 %v398_v21, %v391_v22 }
 0x4eb   :  { %vm402_vm3 = vcmp.eq.f32.partialorder %v1919_v23, %v400_v24  ;;  %v1925_v26 = vsub.f32 %v1919_v23, %v400_v24  ;;  %v420_v41 = vsub.f32 %v1919_v23, %v1913_v18  ;;  %v424_v42 = vsub.f32 %v1919_v23, %v1909_v13 }
 0x4ec   :  { %v393_v29 = vpop.permute.xlu0 %392  ;;  %v428_v43 = vsub.f32 %v1919_v23, %v391_v22  ;;  %v406_v45 = vsel %vm402_vm3, 1.0, %v1919_v23  ;;  %vm432_vm5 = vcmp.eq.f32.partialorder %v1919_v23, %v1913_v18  ;;  %vm438_vm6 = vcmp.eq.f32.partialorder %v1919_v23, %v1909_v13 }
 0x4ed   :  { %v412_v30 = vsel %vm402_vm3, 1.0, %v1925_v26  ;;  %v1934_v31 = vmax.f32 %v387_v27, %v393_v29  ;;  %v401_v32 = vmin.f32 %v399_v28, %v393_v29  ;;  %vm440_vm7 = vcmp.ne.f32.partialorder %v1919_v23, %v1913_v18 }
 0x4ee   :  { %1534 = vrcp.f32 %v412_v30  ;;  %vm450_vm8 = vcmp.ne.f32.partialorder %v1919_v23, %v1909_v13  ;;  %vm442_vm9 = vmand %vm438_vm6, %vm440_vm7 }
 0x4ef   :  { %vm403_vm4 = vcmp.eq.f32.partialorder %v1934_v31, %v401_v32  ;;  %v1938_v33 = vsub.f32 %v1934_v31, %v401_v32  ;;  %v421_v54 = vsub.f32 %v1934_v31, %v1921_v25  ;;  %v425_v55 = vsub.f32 %v1934_v31, %v1911_v16  ;;  %vm452_vm12 = vmand %vm450_vm8, %vm440_vm7 }
 0x4f0   :  { %s1478_s29 = spop %1477  ;;  %v429_v56 = vsub.f32 %v1934_v31, %v393_v29  ;;  %v407_v63 = vsel %vm403_vm4, 1.0, %v1934_v31  ;;  %vm439_vm10 = vcmp.eq.f32.partialorder %v1934_v31, %v1911_v16  ;;  %vm441_vm11 = vcmp.ne.f32.partialorder %v1934_v31, %v1921_v25 }
 0x4f1   :  { %s916_s1 = smul.f32 0.00390625, %s1478_s29  ;;  %v413_v35 = vsel %vm403_vm4, 1.0, %v1938_v33  ;;  %vm451_vm13 = vcmp.ne.f32.partialorder %v1934_v31, %v1911_v16  ;;  %vm433_vm14 = vcmp.eq.f32.partialorder %v1934_v31, %v1921_v25  ;;  %vm443_vm15 = vmand %vm439_vm10, %vm441_vm11  ;;  %v473_v16 = vstv %s1994_s7 }
 0x4f2   :  { %1536 = vrcp.f32 %v413_v35  ;;  %vm453_vm3 = vmand %vm451_vm13, %vm441_vm11 }
 0x4f3   :  { %s921_s30 = smul.f32 %s920_s28, %s916_s1  ;;  %1538 = vrcp.f32 %v406_v45 }
 0x4f4   :  { %1540 = vrcp.f32 %v407_v63 }
 0x4f5   :  { %v922_v38 = vstv %s921_s30 }
 0x4f6   :  { %v923_v39 = vadd.f32 %v922_v38, %v918_v36  ;;  %v924_v40 = vadd.f32 %v922_v38, %v919_v37 }
 0x4f8   :  { %v1535_v44 = vpop.eup %1534  ;;  %v925_v46 = vmax.f32 %v923_v39, 0.0  ;;  %v926_v57 = vmax.f32 %v924_v40, 0.0 }
 0x4f9   :  { %v422_v47 = vmul.f32 %v1535_v44, %v420_v41  ;;  %v426_v17 = vmul.f32 %v1535_v44, %v424_v42  ;;  %v430_v48 = vmul.f32 %v1535_v44, %v428_v43 }
 0x4fa   :  { %v1959_v49 = vmin.f32 %v925_v46, 1.0  ;;  %v1961_v50 = vmin.f32 %v926_v57, 1.0 }
 0x4fb   :  { %v434_v51 = vsub.f32 %v430_v48, %v426_v17  ;;  %v444_v52 = vadd.f32 2.0, %v422_v47  ;;  %v454_v53 = vadd.f32 4.0, %v426_v17 }
 0x4fc   :  { %v944_v58 = vmul.f32 0.114, %v1961_v50  ;;  %v931_v59 = vmul.f32 0.587, %v1959_v49  ;;  %v1537_v60 = vpop.eup %1536  ;;  %v932_v9 = vmul.f32 0.587, %v1961_v50 }
 0x4fd   :  { %v446_v61 = vsub.f32 %v444_v52, %v430_v48  ;;  %v456_v62 = vsub.f32 %v454_v53, %v422_v47  ;;  %v423_v0 = vmul.f32 %v1537_v60, %v421_v54  ;;  %v427_v2 = vmul.f32 %v1537_v60, %v425_v55  ;;  %v1539_v27 = vpop.eup %1538 }
 0x4fe   :  { %v431_v3 = vmul.f32 %v1537_v60, %v429_v56  ;;  %949 = vrot.lane.b32.xlu1 %v944_v58, %s1712_s9  ;;  %935 = vrot.lane.b32.xlu0 %v931_v59, %s1713_s10  ;;  %v436_v4 = vsel %vm432_vm5, %v434_v51, 0.0  ;;  %v943_v20 = vmul.f32 0.114, %v1959_v49  ;;  %v1541_v34 = vpop.eup %1540  ;;  %v418_v38 = vmul.f32 %v1539_v27, %v1925_v26 }
 0x4ff   :  { %v448_v5 = vsel %vm442_vm9, %v446_v61, 0.0  ;;  %v445_v8 = vadd.f32 2.0, %v423_v0  ;;  %v458_v10 = vsel %vm452_vm12, %v456_v62, 0.0  ;;  %v455_v11 = vadd.f32 4.0, %v427_v2 }
 0x500   :  { %v460_v6 = vadd.f32 %v448_v5, %v436_v4  ;;  %v435_v7 = vsub.f32 %v431_v3, %v427_v2  ;;  %v419_v25 = vmul.f32 %v1541_v34, %v1938_v33  ;;  %v486_v44 = vsub.f32 1.0, %v418_v38 }
 0x501   :  { %v447_v13 = vsub.f32 %v445_v8, %v431_v3  ;;  %v457_v14 = vsub.f32 %v455_v11, %v423_v0 }
 0x502   :  { %v462_v12 = vadd.f32 %v460_v6, %v458_v10  ;;  %937 = vrot.lane.b32.xlu0 %v932_v9, %s1713_s10  ;;  %v437_v18 = vsel %vm433_vm14, %v435_v7, 0.0  ;;  %v487_v45 = vsub.f32 1.0, %v419_v25  ;;  %v488_v48 = vmul.f32 %v486_v44, %v1919_v23 }
 0x503   :  { %v449_v19 = vsel %vm443_vm15, %v447_v13, 0.0  ;;  %v459_v24 = vsel %vm453_vm3, %v457_v14, 0.0  ;;  %vm599_vm14 = vcmask 261120  }
 0x504   :  { %v465_v15 = vmul.f32 0.16666667, %v462_v12  ;;  %v461_v21 = vadd.f32 %v449_v19, %v437_v18  ;;  %v489_v51 = vmul.f32 %v487_v45, %v1934_v31  ;;  %v490_v54 = vmax.f32 %v488_v48, 0.0 }
 0x506   :  { %v467_v22 = vadd.f32 1.0, %v465_v15  ;;  %947 = vrot.lane.b32.xlu0 %v943_v20, %s1712_s9  ;;  %v463_v28 = vadd.f32 %v461_v21, %v459_v24  ;;  %v491_v58 = vmax.f32 %v489_v51, 0.0  ;;  %v492_v0 = vmin.f32 %v490_v54, 1.0 }
 0x507   :  { %v564_v51 = vstv %s2027_s8 }
 0x508   :  { %v469_v29 = vfloor.f32 %v467_v22  ;;  %v466_v30 = vmul.f32 0.16666667, %v463_v28  ;;  %v493_v3 = vmin.f32 %v491_v58, 1.0 }
 0x50a   :  { %v471_v32 = vsub.f32 %v467_v22, %v469_v29  ;;  %v468_v35 = vadd.f32 1.0, %v466_v30 }
 0x50c   :  { %v474_v36 = vadd.f32 %v473_v16, %v471_v32  ;;  %v470_v37 = vfloor.f32 %v468_v35 }
 0x50e   :  { %v476_v39 = vfloor.f32 %v474_v36  ;;  %v472_v40 = vsub.f32 %v468_v35, %v470_v37 }
 0x510   :  { %v478_v41 = vsub.f32 %v474_v36, %v476_v39  ;;  %v475_v42 = vadd.f32 %v473_v16, %v472_v40 }
 0x512   :  { %v480_v43 = vmul.f32 6.0, %v478_v41  ;;  %v477_v46 = vfloor.f32 %v475_v42 }
 0x514   :  { %v2015_v57 = vfloor.f32 %v480_v43  ;;  %v479_v47 = vsub.f32 %v475_v42, %v477_v46 }
 0x516   :  { %v484_v17 = vsub.f32 %v480_v43, %v2015_v57  ;;  %v481_v26 = vmul.f32 6.0, %v479_v47  ;;  %vm524_vm4 = vcmp.eq.f32.partialorder %v2015_v57, 4.0  ;;  %vm516_vm5 = vcmp.eq.f32.partialorder %v2015_v57, 0.0 }
 0x517   :  { %vm518_vm6 = vcmp.eq.f32.partialorder %v2015_v57, 1.0  ;;  %vm520_vm7 = vcmp.eq.f32.partialorder %v2015_v57, 2.0  ;;  %vm522_vm9 = vcmp.eq.f32.partialorder %v2015_v57, 3.0 }
 0x518   :  { %v494_v52 = vmul.f32 %v484_v17, %v418_v38  ;;  %v504_v53 = vsub.f32 1.0, %v484_v17  ;;  %v2020_v33 = vfloor.f32 %v481_v26 }
 0x51a   :  { %v496_v55 = vsub.f32 1.0, %v494_v52  ;;  %v506_v56 = vmul.f32 %v504_v53, %v418_v38  ;;  %v485_v59 = vsub.f32 %v481_v26, %v2020_v33  ;;  %vm525_vm8 = vcmp.eq.f32.partialorder %v2020_v33, 4.0 }
 0x51b   :  { %vm519_vm10 = vcmp.eq.f32.partialorder %v2020_v33, 1.0  ;;  %vm521_vm11 = vcmp.eq.f32.partialorder %v2020_v33, 2.0  ;;  %vm523_vm12 = vcmp.eq.f32.partialorder %v2020_v33, 3.0  ;;  %vm517_vm13 = vcmp.eq.f32.partialorder %v2020_v33, 0.0 }
 0x51c   :  { %v498_v60 = vmul.f32 %v496_v55, %v1919_v23  ;;  %v508_v61 = vsub.f32 1.0, %v506_v56  ;;  %v495_v62 = vmul.f32 %v485_v59, %v419_v25  ;;  %v505_v63 = vsub.f32 1.0, %v485_v59 }
 0x51d   :  { %v568_v26 = vstv %s567_s4 }
 0x51e   :  { %v500_v2 = vmax.f32 %v498_v60, 0.0  ;;  %v510_v4 = vmul.f32 %v508_v61, %v1919_v23  ;;  %v497_v5 = vsub.f32 1.0, %v495_v62  ;;  %v507_v6 = vmul.f32 %v505_v63, %v419_v25 }
 0x520   :  { %v502_v7 = vmin.f32 %v500_v2, 1.0  ;;  %v512_v8 = vmax.f32 %v510_v4, 0.0  ;;  %v499_v9 = vmul.f32 %v497_v5, %v1934_v31  ;;  %v509_v10 = vsub.f32 1.0, %v507_v6 }
 0x522   :  { %v544_v11 = vsel %vm524_vm4, %v1919_v23, %v502_v7  ;;  %v514_v12 = vmin.f32 %v512_v8, 1.0  ;;  %v536_v13 = vsel %vm522_vm9, %v502_v7, %v492_v0  ;;  %v501_v14 = vmax.f32 %v499_v9, 0.0 }
 0x523   :  { %v511_v15 = vmul.f32 %v509_v10, %v1934_v31  ;;  %v538_v18 = vsel %vm520_vm7, %v1919_v23, %v536_v13  ;;  %v546_v19 = vsel %vm522_vm9, %v1919_v23, %v544_v11  ;;  %v930_v13 = vmul.f32 0.2989, %v1961_v50 }
 0x524   :  { %v526_v20 = vsel %vm524_vm4, %v514_v12, %v1919_v23  ;;  %v540_v21 = vsel %vm518_vm6, %v1919_v23, %v538_v18  ;;  %v548_v22 = vsel %vm520_vm7, %v514_v12, %v546_v19  ;;  %v503_v24 = vmin.f32 %v501_v14, 1.0 }
 0x525   :  { %v513_v27 = vmax.f32 %v511_v15, 0.0  ;;  %v528_v28 = vsel %vm522_vm9, %v492_v0, %v526_v20  ;;  %v542_v29 = vsel %vm516_vm5, %v514_v12, %v540_v21  ;;  %v550_v30 = vsel %vm518_vm6, %v492_v0, %v548_v22 }
 0x526   :  { %v530_v16 = vsel %vm520_vm7, %v492_v0, %v528_v28  ;;  %v556_v32 = vmul.f32 0.587, %v542_v29  ;;  %v545_v34 = vsel %vm525_vm8, %v1934_v31, %v503_v24  ;;  %v537_v37 = vsel %vm523_vm12, %v503_v24, %v493_v3 }
 0x527   :  { %v515_v35 = vmin.f32 %v513_v27, 1.0  ;;  %v532_v36 = vsel %vm518_vm6, %v502_v7, %v530_v16  ;;  %v539_v39 = vsel %vm521_vm11, %v1934_v31, %v537_v37  ;;  %v547_v25 = vsel %vm523_vm12, %v1934_v31, %v545_v34 }
 0x528   :  { %v534_v38 = vsel %vm516_vm5, %v1919_v23, %v532_v36  ;;  %v552_v40 = vsel %vm516_vm5, %v492_v0, %v550_v30  ;;  %v541_v23 = vsel %vm519_vm10, %v1934_v31, %v539_v39  ;;  %v573_v2 = vmul.f32 %v568_v26, %v542_v29 }
 0x529   :  { %v527_v41 = vsel %vm525_vm8, %v515_v35, %v1934_v31  ;;  %v549_v42 = vsel %vm521_vm11, %v515_v35, %v547_v25  ;;  %v554_v43 = vmul.f32 0.2989, %v534_v38  ;;  %v543_v57 = vsel %vm517_vm13, %v515_v35, %v541_v23 }
 0x52a   :  { %v529_v44 = vsel %vm523_vm12, %v493_v3, %v527_v41  ;;  %v551_v45 = vsel %vm519_vm10, %v493_v3, %v549_v42  ;;  %v560_v17 = vmul.f32 0.114, %v552_v40  ;;  %v569_v55 = vmul.f32 %v568_v26, %v534_v38  ;;  %v1526_v41 = vld [vmem:[#allocation10] sm:$0xff]  }
 0x52b   :  { %v531_v46 = vsel %vm521_vm11, %v493_v3, %v529_v44  ;;  %v558_v47 = vadd.f32 %v556_v32, %v554_v43  ;;  %v553_v53 = vsel %vm517_vm13, %v493_v3, %v551_v45  ;;  %v557_v58 = vmul.f32 0.587, %v543_v57 }
 0x52c   :  { %v533_v48 = vsel %vm519_vm10, %v503_v24, %v531_v46  ;;  %v561_v62 = vmul.f32 0.114, %v553_v53  ;;  %v574_v5 = vmul.f32 %v568_v26, %v543_v57  ;;  %v577_v33 = vmul.f32 %v568_v26, %v552_v40 }
 0x52d   :  { %v535_v52 = vsel %vm517_vm13, %v1934_v31, %v533_v48  ;;  %v562_v54 = vadd.f32 %v560_v17, %v558_v47  ;;  %v578_v6 = vmul.f32 %v568_v26, %v553_v53  ;;  %v929_v15 = vmul.f32 0.2989, %v1959_v49 }
 0x52e   :  { %v555_v56 = vmul.f32 0.2989, %v535_v52  ;;  %v570_v59 = vmul.f32 %v568_v26, %v535_v52  ;;  %v959_v20 = vstv %s958_s11  ;;  %v955_v23 = vstv %s2099_s24 }
 0x52f   :  { %v565_v60 = vmul.f32 %v564_v51, %v562_v54  ;;  %v956_v42 = vmul.f32 %v955_v23, %v1959_v49  ;;  %v957_v46 = vmul.f32 %v955_v23, %v1961_v50  ;;  %v1527_v50 = vld [vmem:[#allocation12] sm:$0xff]  }
 0x530   :  { %v559_v61 = vadd.f32 %v557_v58, %v555_v56 }
 0x531   :  { %v571_v63 = vadd.f32 %v569_v55, %v565_v60  ;;  %v575_v7 = vadd.f32 %v573_v2, %v565_v60  ;;  %v579_v9 = vadd.f32 %v577_v33, %v565_v60  ;;  %v1529_v60 = vld [vmem:[#allocation12 + $0x10] sm:$0xff]  }
 0x532   :  { %v563_v0 = vadd.f32 %v561_v62, %v559_v61 }
 0x534   :  { %v566_v4 = vmul.f32 %v564_v51, %v563_v0 }
 0x536   :  { %v576_v8 = vadd.f32 %v574_v5, %v566_v4  ;;  %v580_v31 = vadd.f32 %v578_v6, %v566_v4  ;;  %v572_v3 = vadd.f32 %v570_v59, %v566_v4  ;;  %v1528_v59 = vld [vmem:[#allocation12 + $0x8] sm:$0xff]  }
 0x538   :  { %v1496_v10 = vpack.i.bf16 %v576_v8, %v575_v7  ;;  %v1501_v11 = vpack.i.bf16 %v580_v31, %v579_v9 }
 0x53a   :  { %1497 = vrot.lane.b32.xlu0 %v1496_v10, %s1714_s25 }
 0x53e   :  { %1502 = vrot.lane.b32.xlu0 %v1501_v11, %s1715_s26 }
 0x570   :  { %v936_v12 = vpop.permute.xlu0 %935  ;;  %v950_v19 = vpop.permute.xlu1 %949 }
 0x571   :  { %v941_v21 = vadd.f32 %v936_v12, %v929_v15 }
 0x574   :  { %v938_v14 = vpop.permute.xlu0 %937 }
 0x575   :  { %v942_v18 = vadd.f32 %v938_v14, %v930_v13 }
 0x577   :  { %v954_v22 = vadd.f32 %v950_v19, %v942_v18 }
 0x578   :  { %v948_v24 = vpop.permute.xlu0 %947 }
 0x579   :  { %v953_v27 = vadd.f32 %v948_v24, %v941_v21  ;;  %v961_v28 = vmul.f32 %v959_v20, %v954_v22 }
 0x57b   :  { %v960_v29 = vmul.f32 %v959_v20, %v953_v27  ;;  %984 = vrot.lane.b32.xlu1 %v961_v28, %s1715_s26  ;;  %v963_v61 = vadd.f32 %v961_v28, %v957_v46 }
 0x57d   :  { %970 = vrot.lane.b32.xlu0 %v960_v29, %s1714_s25  ;;  %v962_v62 = vadd.f32 %v960_v29, %v956_v42 }
 0x57f   :  { %v964_v0 = vmax.f32 %v962_v62, 0.0 }
 0x581   :  { %972 = vrot.lane.b32.xlu0 %v961_v28, %s1714_s25  ;;  %v2128_v33 = vmin.f32 %v964_v0, 1.0 }
 0x585   :  { %982 = vrot.lane.b32.xlu0 %v960_v29, %s1715_s26 }
 0x5ac   :  { %v1498_v16 = vpop.permute.xlu0 %1497 }
 0x5ad   :  { %v1500_v30 = vunpack.i.h.bf16 %v1498_v16  ;;  %v1499_v32 = vunpack.i.l.bf16 %v1498_v16 }
 0x5af   :  { %v597_v37 = vsel %vm144_vm1, %v571_v63, %v1499_v32  ;;  %v598_v38 = vsel %vm144_vm1, %v572_v3, %v1500_v30  ;;  %v965_v63 = vmax.f32 %v963_v61, 0.0 }
 0x5b0   :  { %v1503_v34 = vpop.permute.xlu0 %1502 }
 0x5b1   :  { %v1505_v35 = vunpack.i.h.bf16 %v1503_v34  ;;  %v1504_v36 = vunpack.i.l.bf16 %v1503_v34  ;;  %v967_v5 = vmin.f32 %v965_v63, 1.0 }
 0x5b3   :  { %v600_v39 = vsel %vm599_vm14, %v597_v37, %v1504_v36  ;;  %v601_v25 = vsel %vm599_vm14, %v598_v38, %v1505_v35 }
 0x5b4   :  { %v602_v40 = vpack.c.bf16 %v601_v25, %v600_v39 }
 0x5b6   :  { %1428 = vmatpush3.bf16.msra.mxu0 %v602_v40 }
 0x5b7   :  { %1433 = vmatprep.subr.bf16.mxu0 %v1710_v1 }
 0x5b9   :  { %1430 = vmatmul.mubr.msk.bf16.vlgmr.msra.gmra.mrb[0].mxu0 %vm144_vm1, %v1526_v41 }
 0x5ba   :  { %1439 = vmatprep.mubr.msk.bf16.mxu0 %vm1711_vm0, %v1710_v1  ;;  %1434 = vmatpush3.bf16.msra.mxu0 %v1527_v50 }
 0x5bb   :  { %1435 = vmatprep.subr.bf16.mxu0 %v1710_v1 }
 0x5be   :  { %1436 = vmatpush3.bf16.msra.mxu0 %v1528_v59 }
 0x5bf   :  { %1437 = vmatprep.subr.bf16.mxu0 %v1710_v1 }
 0x5c2   :  { %1438 = vmatpush3.bf16.msra.mxu0 %v1529_v60 }
 0x5c3   :  { %1459 = vmatprep.subr.bf16.mxu0 %v1710_v1 }
 0x5ed   :  { %v985_v45 = vpop.permute.xlu1 %984 }
 0x5ee   :  { %v989_v17 = vadd.f32 %v985_v45, %v957_v46 }
 0x5ef   :  { %v971_v43 = vpop.permute.xlu0 %970 }
 0x5f0   :  { %v976_v44 = vadd.f32 %v971_v43, %v956_v42  ;;  %v991_v53 = vmax.f32 %v989_v17, 0.0 }
 0x5f2   :  { %v978_v57 = vmax.f32 %v976_v44, 0.0  ;;  %v993_v49 = vmin.f32 %v991_v53, 1.0 }
 0x5f3   :  { %v973_v47 = vpop.permute.xlu0 %972 }
 0x5f4   :  { %v980_v48 = vmin.f32 %v978_v57, 1.0  ;;  %v977_v51 = vadd.f32 %v973_v47, %v957_v46 }
 0x5f6   :  { %v979_v26 = vmax.f32 %v977_v51, 0.0  ;;  %996 = vrot.lane.b32.xlu0 %v980_v48, %s1713_s10 }
 0x5f7   :  { %v983_v52 = vpop.permute.xlu0 %982 }
 0x5f8   :  { %v981_v54 = vmin.f32 %v979_v26, 1.0  ;;  %v988_v55 = vadd.f32 %v983_v52, %v956_v42 }
 0x5fa   :  { %v990_v56 = vmax.f32 %v988_v55, 0.0  ;;  %998 = vrot.lane.b32.xlu1 %v981_v54, %s1713_s10 }
 0x5fc   :  { %v992_v58 = vmin.f32 %v990_v56, 1.0 }
 0x5fe   :  { %1008 = vrot.lane.b32.xlu1 %v993_v49, %s1712_s9  ;;  %1006 = vrot.lane.b32.xlu0 %v992_v58, %s1712_s9 }
 0x668   :  { %v2126_v2 = vpop.permute.xlu0 %996 }
 0x669   :  { %v1002_v9 = vmax.f32 %v2128_v33, %v2126_v2  ;;  %v1014_v31 = vmin.f32 %v2128_v33, %v2126_v2 }
 0x66c   :  { %v999_v4 = vpop.permute.xlu1 %998 }
 0x66d   :  { %v1003_v6 = vmax.f32 %v967_v5, %v999_v4  ;;  %v1015_v7 = vmin.f32 %v967_v5, %v999_v4 }
 0x670   :  { %v1009_v8 = vpop.permute.xlu1 %1008  ;;  %v1007_v3 = vpop.permute.xlu0 %1006 }
 0x671   :  { %v2134_v10 = vmax.f32 %v1003_v6, %v1009_v8  ;;  %v1017_v11 = vmin.f32 %v1015_v7, %v1009_v8  ;;  %v2136_v12 = vmax.f32 %v1002_v9, %v1007_v3  ;;  %v1016_v13 = vmin.f32 %v1014_v31, %v1007_v3 }
 0x673   :  { %vm1019_vm15 = vcmp.eq.f32.partialorder %v2134_v10, %v1017_v11  ;;  %v2140_v14 = vsub.f32 %v2134_v10, %v1017_v11  ;;  %vm1018_vm3 = vcmp.eq.f32.partialorder %v2136_v12, %v1016_v13  ;;  %v2145_v18 = vsub.f32 %v2136_v12, %v1016_v13 }
 0x674   :  { %v1037_v20 = vsub.f32 %v2134_v10, %v967_v5  ;;  %v1041_v21 = vsub.f32 %v2134_v10, %v999_v4  ;;  %v1045_v22 = vsub.f32 %v2134_v10, %v1009_v8  ;;  %v1023_v27 = vsel %vm1019_vm15, 1.0, %v2134_v10 }
 0x675   :  { %v1029_v15 = vsel %vm1019_vm15, 1.0, %v2140_v14  ;;  %v1028_v19 = vsel %vm1018_vm3, 1.0, %v2145_v18  ;;  %vm1049_vm4 = vcmp.eq.f32.partialorder %v2134_v10, %v967_v5  ;;  %vm1055_vm5 = vcmp.eq.f32.partialorder %v2134_v10, %v999_v4 }
 0x676   :  { %1542 = vrcp.f32 %v1029_v15  ;;  %v1036_v30 = vsub.f32 %v2136_v12, %v2128_v33  ;;  %v1040_v32 = vsub.f32 %v2136_v12, %v2126_v2  ;;  %v1044_v34 = vsub.f32 %v2136_v12, %v1007_v3 }
 0x677   :  { %1544 = vrcp.f32 %v1028_v19  ;;  %vm1057_vm6 = vcmp.ne.f32.partialorder %v2134_v10, %v967_v5  ;;  %vm1067_vm7 = vcmp.ne.f32.partialorder %v2134_v10, %v999_v4  ;;  %v1022_v42 = vsel %vm1018_vm3, 1.0, %v2136_v12 }
 0x678   :  { %vm1054_vm8 = vcmp.eq.f32.partialorder %v2136_v12, %v2126_v2  ;;  %vm1059_vm9 = vmand %vm1055_vm5, %vm1057_vm6  ;;  %vm1056_vm10 = vcmp.ne.f32.partialorder %v2136_v12, %v2128_v33  ;;  %1546 = vrcp.f32 %v1023_v27  ;;  %vm1066_vm12 = vcmp.ne.f32.partialorder %v2136_v12, %v2126_v2 }
 0x679   :  { %vm1069_vm11 = vmand %vm1067_vm7, %vm1057_vm6  ;;  %1548 = vrcp.f32 %v1022_v42  ;;  %vm1048_vm13 = vcmp.eq.f32.partialorder %v2136_v12, %v2128_v33  ;;  %v1088_v4 = vstv %s2182_s13 }
 0x67a   :  { %vm1058_vm15 = vmand %vm1054_vm8, %vm1056_vm10 }
 0x67b   :  { %vm1068_vm3 = vmand %vm1066_vm12, %vm1056_vm10 }
 0x680   :  { %v1543_v24 = vpop.eup %1542 }
 0x681   :  { %v1039_v28 = vmul.f32 %v1543_v24, %v1037_v20  ;;  %v1043_v29 = vmul.f32 %v1543_v24, %v1041_v21  ;;  %v1047_v16 = vmul.f32 %v1543_v24, %v1045_v22  ;;  %v1545_v35 = vpop.eup %1544 }
 0x682   :  { %v1038_v39 = vmul.f32 %v1545_v35, %v1036_v30  ;;  %v1042_v25 = vmul.f32 %v1545_v35, %v1040_v32  ;;  %v1046_v40 = vmul.f32 %v1545_v35, %v1044_v34  ;;  %v1547_v2 = vpop.eup %1546 }
 0x683   :  { %v1051_v36 = vsub.f32 %v1047_v16, %v1043_v29  ;;  %v1061_v37 = vadd.f32 2.0, %v1039_v28  ;;  %v1071_v38 = vadd.f32 4.0, %v1043_v29  ;;  %v1549_v6 = vpop.eup %1548  ;;  %v1035_v9 = vmul.f32 %v1547_v2, %v2140_v14 }
 0x684   :  { %v1050_v43 = vsub.f32 %v1046_v40, %v1042_v25  ;;  %v1060_v44 = vadd.f32 2.0, %v1038_v39  ;;  %v1070_v45 = vadd.f32 4.0, %v1042_v25  ;;  %v1034_v31 = vmul.f32 %v1549_v6, %v2145_v18 }
 0x685   :  { %v1063_v41 = vsub.f32 %v1061_v37, %v1047_v16  ;;  %v1073_v23 = vsub.f32 %v1071_v38, %v1039_v28  ;;  %v1053_v46 = vsel %vm1049_vm4, %v1051_v36, 0.0  ;;  %v1102_v19 = vsub.f32 1.0, %v1035_v9 }
 0x686   :  { %v1062_v17 = vsub.f32 %v1060_v44, %v1046_v40  ;;  %v1072_v51 = vsub.f32 %v1070_v45, %v1038_v39  ;;  %v1052_v52 = vsel %vm1048_vm13, %v1050_v43, 0.0  ;;  %v1101_v21 = vsub.f32 1.0, %v1034_v31 }
 0x687   :  { %v1065_v57 = vsel %vm1059_vm9, %v1063_v41, 0.0  ;;  %v1075_v48 = vsel %vm1069_vm11, %v1073_v23, 0.0  ;;  %v1104_v28 = vmul.f32 %v1102_v19, %v2134_v10 }
 0x688   :  { %v1077_v47 = vadd.f32 %v1065_v57, %v1053_v46  ;;  %v1064_v53 = vsel %vm1058_vm15, %v1062_v17, 0.0  ;;  %v1074_v56 = vsel %vm1068_vm3, %v1072_v51, 0.0  ;;  %v1103_v16 = vmul.f32 %v1101_v21, %v2136_v12 }
 0x689   :  { %v1076_v54 = vadd.f32 %v1064_v53, %v1052_v52  ;;  %v1106_v34 = vmax.f32 %v1104_v28, 0.0 }
 0x68a   :  { %v1079_v26 = vadd.f32 %v1077_v47, %v1075_v48  ;;  %v1105_v36 = vmax.f32 %v1103_v16, 0.0 }
 0x68b   :  { %v1078_v58 = vadd.f32 %v1076_v54, %v1074_v56  ;;  %v1108_v23 = vmin.f32 %v1106_v34, 1.0  ;;  %v1179_v34 = vstv %s2214_s14 }
 0x68c   :  { %v1081_v55 = vmul.f32 0.16666667, %v1079_v26  ;;  %v645_v49 = vpop.f32.mrb[0].mxu0  ;;  %v1107_v42 = vmin.f32 %v1105_v36, 1.0 }
 0x68d   :  { %v1431_v50 = vpop.f32.mrb[1].mxu0  ;;  %v1080_v61 = vmul.f32 0.16666667, %v1078_v58 }
 0x68e   :  { %v1083_v59 = vadd.f32 1.0, %v1081_v55  ;;  %v648_v60 = vpop.f32.mrb[2].mxu0 }
 0x68f   :  { %v652_v62 = vpack.c.bf16 %v648_v60, %v645_v49  ;;  %v1432_v63 = vpop.f32.mrb[3].mxu0  ;;  %v1082_v5 = vadd.f32 1.0, %v1080_v61 }
 0x690   :  { %v1085_v0 = vfloor.f32 %v1083_v59 }
 0x691   :  { %1440 = vmatmul.mubr.msk.bf16.vlgmr.msra.gmra.mrb[4].mxu0 %vm208_vm2, %v652_v62  ;;  %v1084_v7 = vfloor.f32 %v1082_v5 }
 0x692   :  { %v1087_v33 = vsub.f32 %v1083_v59, %v1085_v0  ;;  %1461 = vmatprep.mubr.msk.bf16.mxu0 %vm1711_vm0, %v1710_v1 }
 0x693   :  { %v1086_v3 = vsub.f32 %v1082_v5, %v1084_v7 }
 0x694   :  { %v1090_v8 = vadd.f32 %v1088_v4, %v1087_v33 }
 0x695   :  { %v1089_v13 = vadd.f32 %v1088_v4, %v1086_v3 }
 0x696   :  { %v1092_v11 = vfloor.f32 %v1090_v8 }
 0x697   :  { %v1091_v20 = vfloor.f32 %v1089_v13 }
 0x698   :  { %v1094_v15 = vsub.f32 %v1090_v8, %v1092_v11 }
 0x699   :  { %v1093_v24 = vsub.f32 %v1089_v13, %v1091_v20 }
 0x69a   :  { %v1096_v22 = vmul.f32 6.0, %v1094_v15 }
 0x69b   :  { %v1095_v29 = vmul.f32 6.0, %v1093_v24 }
 0x69c   :  { %v2201_v27 = vfloor.f32 %v1096_v22 }
 0x69d   :  { %v2206_v30 = vfloor.f32 %v1095_v29 }
 0x69e   :  { %v1100_v14 = vsub.f32 %v1096_v22, %v2201_v27  ;;  %vm1140_vm4 = vcmp.eq.f32.partialorder %v2201_v27, 4.0  ;;  %vm1132_vm5 = vcmp.eq.f32.partialorder %v2201_v27, 0.0  ;;  %vm1134_vm6 = vcmp.eq.f32.partialorder %v2201_v27, 1.0 }
 0x69f   :  { %v1099_v35 = vsub.f32 %v1095_v29, %v2206_v30  ;;  %vm1136_vm7 = vcmp.eq.f32.partialorder %v2201_v27, 2.0  ;;  %vm1139_vm8 = vcmp.eq.f32.partialorder %v2206_v30, 4.0  ;;  %vm1138_vm9 = vcmp.eq.f32.partialorder %v2201_v27, 3.0 }
 0x6a0   :  { %v1110_v18 = vmul.f32 %v1100_v14, %v1035_v9  ;;  %v1120_v32 = vsub.f32 1.0, %v1100_v14  ;;  %vm1131_vm10 = vcmp.eq.f32.partialorder %v2206_v30, 0.0  ;;  %vm1133_vm11 = vcmp.eq.f32.partialorder %v2206_v30, 1.0 }
 0x6a1   :  { %v1109_v39 = vmul.f32 %v1099_v35, %v1034_v31  ;;  %v1119_v25 = vsub.f32 1.0, %v1099_v35  ;;  %vm1135_vm12 = vcmp.eq.f32.partialorder %v2206_v30, 2.0  ;;  %vm1137_vm13 = vcmp.eq.f32.partialorder %v2206_v30, 3.0 }
 0x6a2   :  { %v1112_v37 = vsub.f32 1.0, %v1110_v18  ;;  %v1122_v38 = vmul.f32 %v1120_v32, %v1035_v9  ;;  %v1183_v29 = vstv %s1182_s15 }
 0x6a3   :  { %v1111_v43 = vsub.f32 1.0, %v1109_v39  ;;  %v1121_v44 = vmul.f32 %v1119_v25, %v1034_v31 }
 0x6a4   :  { %v1114_v40 = vmul.f32 %v1112_v37, %v2134_v10  ;;  %v1124_v41 = vsub.f32 1.0, %v1122_v38 }
 0x6a5   :  { %v1113_v57 = vmul.f32 %v1111_v43, %v2136_v12  ;;  %v1123_v47 = vsub.f32 1.0, %v1121_v44 }
 0x6a6   :  { %v1116_v45 = vmax.f32 %v1114_v40, 0.0  ;;  %v1126_v46 = vmul.f32 %v1124_v41, %v2134_v10 }
 0x6a7   :  { %v1115_v51 = vmax.f32 %v1113_v57, 0.0  ;;  %v1125_v26 = vmul.f32 %v1123_v47, %v2136_v12 }
 0x6a8   :  { %v1118_v17 = vmin.f32 %v1116_v45, 1.0  ;;  %v1128_v48 = vmax.f32 %v1126_v46, 0.0 }
 0x6a9   :  { %v1117_v55 = vmin.f32 %v1115_v51, 1.0  ;;  %v1127_v56 = vmax.f32 %v1125_v26, 0.0 }
 0x6aa   :  { %v1130_v52 = vmin.f32 %v1128_v48, 1.0  ;;  %v1152_v53 = vsel %vm1138_vm9, %v1118_v17, %v1108_v23  ;;  %v1160_v54 = vsel %vm1140_vm4, %v2134_v10, %v1118_v17 }
 0x6ab   :  { %v1154_v49 = vsel %vm1136_vm7, %v2134_v10, %v1152_v53  ;;  %v1162_v58 = vsel %vm1138_vm9, %v2134_v10, %v1160_v54  ;;  %v1129_v61 = vmin.f32 %v1127_v56, 1.0  ;;  %v1151_v63 = vsel %vm1137_vm13, %v1117_v55, %v1107_v42 }
 0x6ac   :  { %v1142_v50 = vsel %vm1140_vm4, %v1130_v52, %v2134_v10  ;;  %v1156_v59 = vsel %vm1134_vm6, %v2134_v10, %v1154_v49  ;;  %v1164_v60 = vsel %vm1136_vm7, %v1130_v52, %v1162_v58  ;;  %v1153_v4 = vsel %vm1135_vm12, %v2136_v12, %v1151_v63 }
 0x6ad   :  { %v1144_v62 = vsel %vm1138_vm9, %v1108_v23, %v1142_v50  ;;  %v1158_v0 = vsel %vm1132_vm5, %v1130_v52, %v1156_v59  ;;  %v1159_v5 = vsel %vm1139_vm8, %v2136_v12, %v1117_v55  ;;  %v1166_v6 = vsel %vm1134_vm6, %v1108_v23, %v1164_v60  ;;  %v1530_v59 = vld [vmem:[#allocation10 + $0x8] sm:$0xff]  }
 0x6ae   :  { %v1146_v2 = vsel %vm1136_vm7, %v1108_v23, %v1144_v62  ;;  %v1141_v33 = vsel %vm1139_vm8, %v1129_v61, %v2136_v12  ;;  %v1155_v8 = vsel %vm1133_vm11, %v2136_v12, %v1153_v4  ;;  %v1161_v9 = vsel %vm1137_vm13, %v2136_v12, %v1159_v5  ;;  %v1531_v60 = vld [vmem:[#allocation12 + $0x18] sm:$0xff]   ;;  %v1533_v4 = vld [vmem:[#allocation12 + $0x28] sm:$0xff]  }
 0x6af   :  { %v1148_v7 = vsel %vm1134_vm6, %v1118_v17, %v1146_v2  ;;  %v1143_v31 = vsel %vm1137_vm13, %v1107_v42, %v1141_v33  ;;  %v1157_v11 = vsel %vm1131_vm10, %v1129_v61, %v1155_v8  ;;  %v1163_v13 = vsel %vm1135_vm12, %v1129_v61, %v1161_v9  ;;  %v1532_v61 = vld [vmem:[#allocation12 + $0x20] sm:$0xff]  }
 0x6b0   :  { %v1150_v3 = vsel %vm1132_vm5, %v2134_v10, %v1148_v7  ;;  %v1145_v15 = vsel %vm1135_vm12, %v1107_v42, %v1143_v31  ;;  %v1165_v19 = vsel %vm1133_vm11, %v1107_v42, %v1163_v13  ;;  %v1168_v20 = vsel %vm1132_vm5, %v1108_v23, %v1166_v6 }
 0x6b1   :  { %v1170_v21 = vmul.f32 0.2989, %v1150_v3  ;;  %v1147_v10 = vsel %vm1133_vm11, %v1117_v55, %v1145_v15  ;;  %v1172_v22 = vmul.f32 0.587, %v1158_v0  ;;  %v1167_v28 = vsel %vm1131_vm10, %v1107_v42, %v1165_v19 }
 0x6b2   :  { %v1149_v24 = vsel %vm1131_vm10, %v2136_v12, %v1147_v10  ;;  %v1171_v14 = vmul.f32 0.587, %v1157_v11  ;;  %v1176_v32 = vmul.f32 0.114, %v1168_v20  ;;  %v1185_v35 = vmul.f32 %v1183_v29, %v1150_v3 }
 0x6b3   :  { %v1169_v16 = vmul.f32 0.2989, %v1149_v24  ;;  %v1174_v18 = vadd.f32 %v1172_v22, %v1170_v21  ;;  %v1184_v27 = vmul.f32 %v1183_v29, %v1149_v24  ;;  %v1175_v37 = vmul.f32 0.114, %v1167_v28 }
 0x6b4   :  { %v1193_v40 = vmul.f32 %v1183_v29, %v1168_v20  ;;  %v1189_v41 = vmul.f32 %v1183_v29, %v1158_v0  ;;  %v1192_v23 = vmul.f32 %v1183_v29, %v1167_v28  ;;  %v1188_v12 = vmul.f32 %v1183_v29, %v1157_v11 }
 0x6b5   :  { %v1173_v36 = vadd.f32 %v1171_v14, %v1169_v16  ;;  %v1178_v38 = vadd.f32 %v1176_v32, %v1174_v18 }
 0x6b7   :  { %v1177_v39 = vadd.f32 %v1175_v37, %v1173_v36  ;;  %v1181_v25 = vmul.f32 %v1179_v34, %v1178_v38 }
 0x6b9   :  { %v1180_v43 = vmul.f32 %v1179_v34, %v1177_v39  ;;  %v1195_v30 = vadd.f32 %v1193_v40, %v1181_v25  ;;  %v1191_v42 = vadd.f32 %v1189_v41, %v1181_v25  ;;  %v1187_v44 = vadd.f32 %v1185_v35, %v1181_v25 }
 0x6bb   :  { %v1194_v45 = vadd.f32 %v1192_v23, %v1180_v43  ;;  %v1190_v46 = vadd.f32 %v1188_v12, %v1180_v43  ;;  %v1186_v57 = vadd.f32 %v1184_v27, %v1180_v43 }
 0x6bd   :  { %v1511_v47 = vpack.i.bf16 %v1195_v30, %v1194_v45  ;;  %v1506_v17 = vpack.i.bf16 %v1191_v42, %v1190_v46 }
 0x6bf   :  { %1512 = vrot.lane.b32.xlu1 %v1511_v47, %s1715_s26  ;;  %1507 = vrot.lane.b32.xlu0 %v1506_v17, %s1714_s25 }
 0x731   :  { %v1513_v48 = vpop.permute.xlu1 %1512  ;;  %v1508_v51 = vpop.permute.xlu0 %1507 }
 0x732   :  { %v1515_v26 = vunpack.i.h.bf16 %v1513_v48  ;;  %v1514_v52 = vunpack.i.l.bf16 %v1513_v48  ;;  %v1510_v53 = vunpack.i.h.bf16 %v1508_v51  ;;  %v1509_v54 = vunpack.i.l.bf16 %v1508_v51 }
 0x734   :  { %v1213_v55 = vsel %vm144_vm1, %v1187_v44, %v1510_v53  ;;  %v1212_v56 = vsel %vm144_vm1, %v1186_v57, %v1509_v54 }
 0x735   :  { %v1215_v49 = vsel %vm599_vm14, %v1213_v55, %v1515_v26  ;;  %v1214_v58 = vsel %vm599_vm14, %v1212_v56, %v1514_v52 }
 0x736   :  { %v1216_v50 = vpack.c.bf16 %v1215_v49, %v1214_v58 }
 0x738   :  { %1460 = vmatpush3.bf16.msra.mxu0 %v1216_v50 }
 0x739   :  { %1465 = vmatprep.subr.bf16.mxu0 %v1710_v1 }
 0x73b   :  { %1462 = vmatmul.mubr.msk.bf16.vlgmr.msra.gmra.mrb[8].mxu0 %vm144_vm1, %v1530_v59 }
 0x73c   :  { %1466 = vmatpush3.bf16.msra.mxu0 %v1531_v60  ;;  %1471 = vmatprep.mubr.msk.bf16.mxu0 %vm1711_vm0, %v1710_v1 }
 0x73d   :  { %1467 = vmatprep.subr.bf16.mxu0 %v1710_v1 }
 0x740   :  { %1468 = vmatpush3.bf16.msra.mxu0 %v1532_v61 }
 0x741   :  { %1469 = vmatprep.subr.bf16.mxu0 %v1710_v1 }
 0x744   :  { %1470 = vmatpush3.bf16.msra.mxu0 %v1533_v4 }
 0x764   :  { %v708_v62 = vpop.f32.mrb[4].mxu0 }
 0x765   :  { %715 = vst.msk [vmem:[#allocation13] sm:$0xff] %vm208_vm2, %v708_v62  ;;  %v1441_v63 = vpop.f32.mrb[5].mxu0 }
 0x766   :  { %v711_v0 = vpop.f32.mrb[6].mxu0 }
 0x767   :  { %716 = vst.msk [vmem:[#allocation13 + $0x8] sm:$0xff] %vm208_vm2, %v711_v0  ;;  %v1442_v2 = vpop.f32.mrb[7].mxu0 }
 0x80e   :  { %v1259_v5 = vpop.f32.mrb[8].mxu0 }
 0x80f   :  { %v1463_v6 = vpop.f32.mrb[9].mxu0 }
 0x810   :  { %v1262_v33 = vpop.f32.mrb[10].mxu0 }
 0x811   :  { %v1266_v7 = vpack.c.bf16 %v1262_v33, %v1259_v5  ;;  %v1464_v8 = vpop.f32.mrb[11].mxu0 }
 0x813   :  { %1472 = vmatmul.mubr.msk.bf16.vlgmr.msra.gmra.mrb[12].mxu0 %vm208_vm2, %v1266_v7 }
 0x8e6   :  { %v1322_v1 = vpop.f32.mrb[12].mxu0 }
 0x8e7   :  { %1330 = vst.msk [vmem:[#allocation13 + $0x10] sm:$0xff] %vm208_vm2, %v1322_v1  ;;  %v1473_v9 = vpop.f32.mrb[13].mxu0 }
 0x8e8   :  { %v1325_v31 = vpop.f32.mrb[14].mxu0 }
 0x8e9   :  { %1331 = vst.msk [vmem:[#allocation13 + $0x18] sm:$0xff] %vm208_vm2, %v1325_v31  ;;  %v1474_v3 = vpop.f32.mrb[15].mxu0 }
 0x8ea   :  { %1681 = shalt.err (!%p1678_p5)
}
 0x8eb   :  { %s1682_s9 = scalar_lea.hbm %s2330_s6, 512 }
 0x8ec   :  { %p1683_p6 = scmp.ne.s32.totalorder %s2330_s6, %s1682_s9  ;;  %p1686_p7 = scmp.lt.u32.totalorder %s1682_s9, %s2330_s6 }
 0x8ee   :  { %p1688_p8 = pnand %p1686_p7, %p1683_p6 }
 0x8f0   :  { %1691 = shalt.err (!%p1688_p8)
}
 0x8f1   :  { %s1717_s20 = smov 128   ;;  %s1718_s2 = smov 8  }
 0x8f2   :  { %1343 = dma.vmem_to_hbm [thread:$0]  %s1338_s17, 512, %s2330_s6, [#allocation4], %s1717_s20, %s1717_s20, %s1718_s2  }
 0x8f3   :  { %1700 = dma.done.wait [#allocation4], 512  }
 0x8f4   :  { %1701 = vsyncadd [#allocation4], 4294966784 }
 0x8f5   :  { %1347 = vsyncpa [#allocation3], 1 }
 0x8f6   :  { %1348 = vsyncpa [#allocation8], 1 }
 0x8f7   :  { %1349 = vsyncpa [#allocation11], 1 }
 0x8f8   :  { %1350 = vsyncpa [#allocation4], 1 }
 0x8f9   :  { %1351 = vsyncpa [#allocation5], 1 }

</bundles_post_ra>
